<compile_context>
chip_gen: v5e
topology: v5e:2x2
jax: 0.10.0
libtpu: 0.0.40
codegen_flags: <defaults>
</compile_context>

<pallas_src>
import functools
import math

import jax
import jax.numpy as jnp
from jax import lax
from jax.experimental import pallas as pl
from jax.experimental.pallas import tpu as pltpu

LANES = 128  # TPU lane width; channel dims are zero-padded to this (lane-dense stores).


def _round_up(x, m):
    return ((x + m - 1) // m) * m


# ---------------------------------------------------------------------------
# Fused kernel: 5 conv / transposed-conv layers on a (TB*lp, 128) channels-last slab
# ---------------------------------------------------------------------------
def _fused_autoencoder_kernel(x_ref, w_ref, b_ref, sel_ref, row_ref, o_ref, *,
                              lp, ksize, layer_cfgs):
    n = x_ref.shape[0]                    # TB * lp stacked rows
    row = row_ref[...]                    # (n, 1) int32 within-sample row index (host-built, hoisted)

    mask_cache = {}

    def shifted(v, d):
        """out[j] = v[j + d] inside each sample's lp-row window; 0 where j+d leaves [0, lp).

        The roll runs over the whole stacked slab (XLU); rows whose within-sample source index
        would leave [0, lp) are zeroed, so contributions never leak across stacked samples and
        the implicit zero padding of Conv1d / ConvTranspose1d is exact.
        pltpu.roll has jnp.roll semantics: out[i] = v[i - shift].
        """
        if d == 0:
            return v
        rolled = pltpu.roll(v, shift=(-d) % n, axis=0)
        if d not in mask_cache:
            src = row + d
            mask_cache[d] = ((src >= 0) & (src < lp)).astype(jnp.float32)
        return rolled * mask_cache[d]

    h = x_ref[...]                                        # (n, 128) bf16, channels-last
    for li, cfg in enumerate(layer_cfgs):
        hb = h.astype(jnp.bfloat16)
        if cfg["up_sel"] is not None:                     # stride-2 ConvTranspose: zero-insertion
            hb = jnp.dot(sel_ref[cfg["up_sel"]], hb,      # exact 0/1 block-diag matrix (bf16 MXU)
                         preferred_element_type=jnp.float32).astype(jnp.bfloat16)
        acc = None
        for k in range(ksize):                            # tap matmuls: bf16 x bf16 -> f32 (MXU)
            xw = jnp.dot(hb, w_ref[li * ksize + k], preferred_element_type=jnp.float32)
            xw = shifted(xw, cfg["offsets"][k])           # tap shift: roll + mask (no matmul)
            acc = xw if acc is None else acc + xw
        acc = acc + b_ref[pl.ds(li, 1), :]                # (1, 128) f32 bias, sublane broadcast
        if cfg["relu"]:
            acc = jnp.maximum(acc, 0.0)
        if cfg["down_sel"] is not None:                   # stride-2 Conv: keep rows s*l (l < lout)
            h = jnp.dot(sel_ref[cfg["down_sel"]], acc.astype(jnp.bfloat16),
                        preferred_element_type=jnp.float32)   # rows >= lout come out exactly 0
        else:                                             # zero rows past the layer's true length
            h = acc * (row < cfg["lout"]).astype(jnp.float32)
        # Dropout(p=0.1) after encoder[0] / decoder[0] is identity in inference mode.
        # TODO(synk): training-mode stochastic dropout (pltpu.prng_seed / prng_random_bits) not implemented.
    o_ref[...] = h


# ---------------------------------------------------------------------------
# Parameter packing (PyTorch layouts -> lane-padded bf16 per-tap matrices) + resampling matrices
# ---------------------------------------------------------------------------
def _pack_conv_weight(w):
    """PyTorch Conv1d weight (Cout, Cin, K) -> (K, 128, 128) bf16 laid out [k, ci, co]."""
    cout, cin, k = w.shape
    wt = jnp.transpose(w, (2, 1, 0)).astype(jnp.float32)
    return jnp.zeros((k, LANES, LANES), jnp.float32).at[:, :cin, :cout].set(wt).astype(jnp.bfloat16)


def _pack_deconv_weight(w):
    """PyTorch ConvTranspose1d weight (Cin, Cout, K) -> (K, 128, 128) bf16 laid out [k, ci, co]."""
    cin, cout, k = w.shape
    wt = jnp.transpose(w, (2, 0, 1)).astype(jnp.float32)
    return jnp.zeros((k, LANES, LANES), jnp.float32).at[:, :cin, :cout].set(wt).astype(jnp.bfloat16)


def _resample_matrix(tb, lp, *, stride, length, kind):
    """Exact 0/1 block-diagonal (tb*lp, tb*lp) resampling matrix, bf16.

    kind == "down": out[r] = in[stride*r] for r < length   (conv stride-s row selection)
    kind == "up":   out[stride*c] = in[c] for c < length    (transposed-conv zero insertion)
    """
    n = tb * lp
    idx = jnp.arange(n, dtype=jnp.int32)
    blk, w = idx // lp, idx % lp
    same = blk[:, None] == blk[None, :]
    if kind == "down":
        hit = (w[None, :] == stride * w[:, None]) & (w[:, None] < length)
    else:
        hit = (w[:, None] == stride * w[None, :]) & (w[None, :] < length)
    return (same & hit).astype(jnp.bfloat16)


# ---------------------------------------------------------------------------
# Fused forward pass
# ---------------------------------------------------------------------------
def conv_autoencoder_forward(params, x, kernel_size, stride=2, batch_tile=None):
    """ConvAutoencoder forward (inference semantics: Dropout = identity, activation = ReLU)."""
    padding = math.ceil((kernel_size - stride) / 2)
    B, C, L = x.shape
    K = kernel_size
    assert C <= LANES and params["enc0_w"].shape[0] <= LANES and params["enc1_w"].shape[0] <= LANES

    def conv_len(lin, s):
        return (lin + 2 * padding - K) // s + 1

    def deconv_len(lin, s, op):
        return (lin - 1) * s - 2 * padding + K + op

    l1 = conv_len(L, stride)
    l2 = conv_len(l1, stride)
    l3 = deconv_len(l2, stride, 1)
    l4 = deconv_len(l3, stride, 1)
    l5 = deconv_len(l4, 1, 0)

    # Common padded length: covers every layer's true length plus the stride-expanded row
    # extents read/written by the resampling matrices.  Multiple of 16 (bf16: 2 rows/sublane).
    extents = [L, l1, l2, l3, l4, l5,
               stride * (l1 - 1) + 1, stride * (l2 - 1) + 1, stride * (l3 - 1) + 1]
    lp = _round_up(max(max(extents), 16), 16)

    # Batch tile: stack TB samples along the matmul M dim (target ~256 rows per grid step).
    if batch_tile is None:
        batch_tile = max(1, min(B, max(1, 256 // lp)))
    tb = int(batch_tile)
    n = tb * lp
    b_pad = _round_up(B, tb)
    grid = (b_pad // tb,)

    conv_off = tuple(k - padding for k in range(K))       # conv tap reads   x[s*l + (k - p)]
    deconv_off = tuple(padding - k for k in range(K))     # deconv tap reads u[j + (p - k)]
    layer_cfgs = (
        dict(lout=l1, offsets=conv_off, relu=True, up_sel=None, down_sel=0),
        dict(lout=l2, offsets=conv_off, relu=True, up_sel=None, down_sel=1),
        dict(lout=l3, offsets=deconv_off, relu=True, up_sel=2, down_sel=None),
        dict(lout=l4, offsets=deconv_off, relu=True, up_sel=3, down_sel=None),
        dict(lout=l5, offsets=deconv_off, relu=False, up_sel=None, down_sel=None),
    )

    # ---- operands (weight-like operands use constant-index BlockSpecs -> resident in VMEM)
    x_cl = jnp.transpose(x, (0, 2, 1)).astype(jnp.float32)                    # (B, L, C)
    x_p = jnp.zeros((b_pad, lp, LANES), jnp.float32).at[:B, :L, :C].set(x_cl)
    x_p = x_p.astype(jnp.bfloat16).reshape(b_pad * lp, LANES)                 # bf16 input slab

    wstack = jnp.concatenate([
        _pack_conv_weight(params["enc0_w"]),
        _pack_conv_weight(params["enc1_w"]),
        _pack_deconv_weight(params["dec0_w"]),
        _pack_deconv_weight(params["dec1_w"]),
        _pack_deconv_weight(params["dec2_w"]),
    ], axis=0)                                                                # (5K, 128, 128) bf16

    bstack = jnp.zeros((8, LANES), jnp.float32)
    for i, name in enumerate(("enc0_b", "enc1_b", "dec0_b", "dec1_b", "dec2_b")):
        bvec = params[name].astype(jnp.float32)
        bstack = bstack.at[i, : bvec.shape[0]].set(bvec)                      # (8, 128) f32

    sel = jnp.stack([
        _resample_matrix(tb, lp, stride=stride, length=l1, kind="down"),
        _resample_matrix(tb, lp, stride=stride, length=l2, kind="down"),
        _resample_matrix(tb, lp, stride=stride, length=l2, kind="up"),
        _resample_matrix(tb, lp, stride=stride, length=l3, kind="up"),
    ])                                                                        # (4, n, n) bf16

    rowidx = (jnp.arange(n, dtype=jnp.int32) % lp).reshape(n, 1)              # (n, 1) int32

    kernel = functools.partial(_fused_autoencoder_kernel, lp=lp, ksize=K, layer_cfgs=layer_cfgs)
    out = pl.pallas_call(
        kernel,
        out_shape=jax.ShapeDtypeStruct((b_pad * lp, LANES), jnp.float32),
        grid=grid,
        in_specs=[
            pl.BlockSpec((n, LANES), lambda i: (i, 0)),                # batch-tiled input slab
            pl.BlockSpec((5 * K, LANES, LANES), lambda i: (0, 0, 0)),  # all layer weights, resident
            pl.BlockSpec((8, LANES), lambda i: (0, 0)),                # all biases, resident
            pl.BlockSpec((4, n, n), lambda i: (0, 0, 0)),              # resampling matrices, resident
            pl.BlockSpec((n, 1), lambda i: (0, 0)),                    # within-sample row index
        ],
        out_specs=pl.BlockSpec((n, LANES), lambda i: (i, 0)),
        compiler_params=pltpu.CompilerParams(
            dimension_semantics=("parallel",),          # independent batch tiles (megacore-friendly)
            vmem_limit_bytes=32 * 1024 * 1024,
        ),
    )(x_p, wstack, bstack, sel, rowidx)

    out = out.reshape(b_pad, lp, LANES)[:B, :l5, :C]
    return jnp.transpose(out, (0, 2, 1))                  # back to PyTorch NCL layout


# ---------------------------------------------------------------------------
# Params + pure-JAX reference (numeric sanity check)
# ---------------------------------------------------------------------------
def init_params(key, in_channels, hidden_channels1, kernel_size):
    hidden_channels2 = hidden_channels1 // 2

    def u(k, shape, fan_in):
        bound = 1.0 / math.sqrt(fan_in)
        return jax.random.uniform(k, shape, jnp.float32, -bound, bound)

    ks = jax.random.split(key, 10)
    return {
        # encoder: Conv1d weights are (Cout, Cin, K)
        "enc0_w": u(ks[0], (hidden_channels1, in_channels, kernel_size), in_channels * kernel_size),
        "enc0_b": u(ks[1], (hidden_channels1,), in_channels * kernel_size),
        "enc1_w": u(ks[2], (hidden_channels2, hidden_channels1, kernel_size), hidden_channels1 * kernel_size),
        "enc1_b": u(ks[3], (hidden_channels2,), hidden_channels1 * kernel_size),
        # decoder: ConvTranspose1d weights are (Cin, Cout, K)
        "dec0_w": u(ks[4], (hidden_channels2, hidden_channels2, kernel_size), hidden_channels2 * kernel_size),
        "dec0_b": u(ks[5], (hidden_channels2,), hidden_channels2 * kernel_size),
        "dec1_w": u(ks[6], (hidden_channels2, hidden_channels1, kernel_size), hidden_channels2 * kernel_size),
        "dec1_b": u(ks[7], (hidden_channels1,), hidden_channels2 * kernel_size),
        "dec2_w": u(ks[8], (hidden_channels1, in_channels, kernel_size), hidden_channels1 * kernel_size),
        "dec2_b": u(ks[9], (in_channels,), hidden_channels1 * kernel_size),
    }


def _reference_forward(params, x, kernel_size, stride=2):
    """Pure-JAX f32 reference with PyTorch Conv1d/ConvTranspose1d semantics."""
    p = math.ceil((kernel_size - stride) / 2)

    def conv(x, w, b, s, pad):
        _, _, L = x.shape
        _, _, K = w.shape
        Lout = (L + 2 * pad - K) // s + 1
        xp = jnp.pad(x, ((0, 0), (0, 0), (pad, pad)))
        idx = jnp.arange(Lout)[:, None] * s + jnp.arange(K)[None, :]
        patches = xp[:, :, idx]                                      # (B, Cin, Lout, K)
        return jnp.einsum("bclk,ock->bol", patches, w) + b[None, :, None]

    def deconv(x, w, b, s, pad, op):
        B, Cin, L = x.shape
        _, _, K = w.shape
        if s > 1:
            xz = jnp.zeros((B, Cin, (L - 1) * s + 1), x.dtype).at[:, :, ::s].set(x)
        else:
            xz = x
        xp = jnp.pad(xz, ((0, 0), (0, 0), (K - 1 - pad, K - 1 - pad + op)))
        w_eq = jnp.flip(w, axis=2).transpose(1, 0, 2)                # (Cout, Cin, K)
        return conv(xp, w_eq, b, 1, 0)

    relu = lambda t: jnp.maximum(t, 0.0)
    h = relu(conv(x, params["enc0_w"], params["enc0_b"], stride, p))
    h = relu(conv(h, params["enc1_w"], params["enc1_b"], stride, p))
    h = relu(deconv(h, params["dec0_w"], params["dec0_b"], stride, p, 1))
    h = relu(deconv(h, params["dec1_w"], params["dec1_b"], stride, p, 1))
    h = deconv(h, params["dec2_w"], params["dec2_b"], 1, p, 0)
    return h


if __name__ == "__main__":
    B, C, L = 2, 4, 16                       # batch, in_channels, sequence length
    hidden_channels1, kernel_size = 8, 3     # hidden_channels2 = 4
    key = jax.random.PRNGKey(0)
    pkey, xkey = jax.random.split(key)

    params = init_params(pkey, C, hidden_channels1, kernel_size)
    x = jax.random.normal(xkey, (B, C, L), jnp.float32)

    fwd = jax.jit(functools.partial(conv_autoencoder_forward, kernel_size=kernel_size, stride=2))
    y = fwd(params, x)
    jax.block_until_ready(y)

    assert y.shape == (B, C, L), y.shape
    assert y.dtype == jnp.float32

    # numeric sanity check vs. f32 reference (kernel uses bf16 MXU operands -> loose tolerance)
    y_ref = _reference_forward(params, x, kernel_size, stride=2)
    err = float(jnp.max(jnp.abs(y - y_ref)))
    assert err < 1e-1, f"max abs err {err}"

    print("KERNEL_OK")
</pallas_src>

<mosaic_0001>
module attributes {stable_mosaic.version = 11 : i64} {
  func.func @_fused_autoencoder_kernel(%arg0: i32, %arg1: memref<32x128xbf16, #tpu.memory_space<vmem>>, %arg2: memref<15x128x128xbf16, #tpu.memory_space<vmem>>, %arg3: memref<8x128xf32, #tpu.memory_space<vmem>>, %arg4: memref<4x32x32xbf16, #tpu.memory_space<vmem>>, %arg5: memref<32x1xi32, #tpu.memory_space<vmem>>, %arg6: memref<32x128xf32, #tpu.memory_space<vmem>>) attributes {dimension_semantics = [#tpu.dimension_semantics<parallel>], iteration_bounds = array<i64: 1>, scalar_prefetch = 0 : i64, scratch_operands = 0 : i64, tpu.core_type = #tpu.core_type<tc>, window_params = [{transform_indices = @transform_0, window_bounds = array<i64: 32, 128>}, {pipeline_mode = #tpu.pipeline_mode<synchronous>, transform_indices = @transform_1, window_bounds = array<i64: 15, 128, 128>}, {pipeline_mode = #tpu.pipeline_mode<synchronous>, transform_indices = @transform_2, window_bounds = array<i64: 8, 128>}, {pipeline_mode = #tpu.pipeline_mode<synchronous>, transform_indices = @transform_3, window_bounds = array<i64: 4, 32, 32>}, {pipeline_mode = #tpu.pipeline_mode<synchronous>, transform_indices = @transform_4, window_bounds = array<i64: 32, 1>}, {transform_indices = @transform_5, window_bounds = array<i64: 32, 128>}]} {
    %c0 = arith.constant 0 : index
    %c0_0 = arith.constant 0 : index
    %0 = vector.load %arg5[%c0, %c0_0] : memref<32x1xi32, #tpu.memory_space<vmem>>, vector<32x1xi32>
    %c0_1 = arith.constant 0 : index
    %c0_2 = arith.constant 0 : index
    %1 = vector.load %arg1[%c0_1, %c0_2] : memref<32x128xbf16, #tpu.memory_space<vmem>>, vector<32x128xbf16>
    %c0_3 = arith.constant 0 : index
    %c0_4 = arith.constant 0 : index
    %c0_5 = arith.constant 0 : index
    %2 = vector.load %arg2[%c0_3, %c0_4, %c0_5] : memref<15x128x128xbf16, #tpu.memory_space<vmem>>, vector<1x128x128xbf16>
    %3 = vector.shape_cast %2 : vector<1x128x128xbf16> to vector<128x128xbf16>
    %cst = arith.constant dense<0.000000e+00> : vector<32x128xf32>
    %4 = tpu.matmul %1, %3, %cst {dimension_numbers = #tpu.dot_dimension_numbers<[1], [0], [0], [1], [0, 0, 1, 1], [], []>} : vector<32x128xbf16>, vector<128x128xbf16>, vector<32x128xf32> -> vector<32x128xf32>
    %c1_i32 = arith.constant 1 : i32
    %5 = tpu.dynamic_rotate %4 by %c1_i32 dim 0 : vector<32x128xf32>, i32 -> vector<32x128xf32>
    %c-1_i32 = arith.constant -1 : i32
    %6 = vector.broadcast %c-1_i32 : i32 to vector<32x1xi32>
    %7 = arith.addi %0, %6 : vector<32x1xi32>
    %c0_i32 = arith.constant 0 : i32
    %8 = vector.broadcast %c0_i32 : i32 to vector<32x1xi32>
    %9 = arith.cmpi sge, %7, %8 : vector<32x1xi32>
    %c16_i32 = arith.constant 16 : i32
    %10 = vector.broadcast %c16_i32 : i32 to vector<32x1xi32>
    %11 = arith.cmpi slt, %7, %10 : vector<32x1xi32>
    %12 = arith.andi %9, %11 : vector<32x1xi1>
    %13 = arith.extui %12 : vector<32x1xi1> to vector<32x1xi32>
    %14 = arith.sitofp %13 : vector<32x1xi32> to vector<32x1xf32>
    %15 = vector.broadcast %14 : vector<32x1xf32> to vector<32x128xf32>
    %16 = arith.mulf %5, %15 : vector<32x128xf32>
    %c1 = arith.constant 1 : index
    %c0_6 = arith.constant 0 : index
    %c0_7 = arith.constant 0 : index
    %17 = vector.load %arg2[%c1, %c0_6, %c0_7] : memref<15x128x128xbf16, #tpu.memory_space<vmem>>, vector<1x128x128xbf16>
    %18 = vector.shape_cast %17 : vector<1x128x128xbf16> to vector<128x128xbf16>
    %cst_8 = arith.constant dense<0.000000e+00> : vector<32x128xf32>
    %19 = tpu.matmul %1, %18, %cst_8 {dimension_numbers = #tpu.dot_dimension_numbers<[1], [0], [0], [1], [0, 0, 1, 1], [], []>} : vector<32x128xbf16>, vector<128x128xbf16>, vector<32x128xf32> -> vector<32x128xf32>
    %20 = arith.addf %16, %19 : vector<32x128xf32>
    %c2 = arith.constant 2 : index
    %c0_9 = arith.constant 0 : index
    %c0_10 = arith.constant 0 : index
    %21 = vector.load %arg2[%c2, %c0_9, %c0_10] : memref<15x128x128xbf16, #tpu.memory_space<vmem>>, vector<1x128x128xbf16>
    %22 = vector.shape_cast %21 : vector<1x128x128xbf16> to vector<128x128xbf16>
    %cst_11 = arith.constant dense<0.000000e+00> : vector<32x128xf32>
    %23 = tpu.matmul %1, %22, %cst_11 {dimension_numbers = #tpu.dot_dimension_numbers<[1], [0], [0], [1], [0, 0, 1, 1], [], []>} : vector<32x128xbf16>, vector<128x128xbf16>, vector<32x128xf32> -> vector<32x128xf32>
    %c31_i32 = arith.constant 31 : i32
    %24 = tpu.dynamic_rotate %23 by %c31_i32 dim 0 : vector<32x128xf32>, i32 -> vector<32x128xf32>
    %c1_i32_12 = arith.constant 1 : i32
    %25 = vector.broadcast %c1_i32_12 : i32 to vector<32x1xi32>
    %26 = arith.addi %0, %25 : vector<32x1xi32>
    %c0_i32_13 = arith.constant 0 : i32
    %27 = vector.broadcast %c0_i32_13 : i32 to vector<32x1xi32>
    %28 = arith.cmpi sge, %26, %27 : vector<32x1xi32>
    %c16_i32_14 = arith.constant 16 : i32
    %29 = vector.broadcast %c16_i32_14 : i32 to vector<32x1xi32>
    %30 = arith.cmpi slt, %26, %29 : vector<32x1xi32>
    %31 = arith.andi %28, %30 : vector<32x1xi1>
    %32 = arith.extui %31 : vector<32x1xi1> to vector<32x1xi32>
    %33 = arith.sitofp %32 : vector<32x1xi32> to vector<32x1xf32>
    %34 = vector.broadcast %33 : vector<32x1xf32> to vector<32x128xf32>
    %35 = arith.mulf %24, %34 : vector<32x128xf32>
    %36 = arith.addf %20, %35 : vector<32x128xf32>
    %c0_15 = arith.constant 0 : index
    %c0_16 = arith.constant 0 : index
    %37 = vector.load %arg3[%c0_15, %c0_16] : memref<8x128xf32, #tpu.memory_space<vmem>>, vector<1x128xf32>
    %38 = vector.broadcast %37 : vector<1x128xf32> to vector<32x128xf32>
    %39 = arith.addf %36, %38 : vector<32x128xf32>
    %cst_17 = arith.constant 0.000000e+00 : f32
    %40 = vector.broadcast %cst_17 : f32 to vector<32x128xf32>
    %41 = arith.maximumf %39, %40 : vector<32x128xf32>
    %c0_18 = arith.constant 0 : index
    %c0_19 = arith.constant 0 : index
    %c0_20 = arith.constant 0 : index
    %42 = vector.load %arg4[%c0_18, %c0_19, %c0_20] : memref<4x32x32xbf16, #tpu.memory_space<vmem>>, vector<1x32x32xbf16>
    %43 = vector.shape_cast %42 : vector<1x32x32xbf16> to vector<32x32xbf16>
    %44 = arith.truncf %41 : vector<32x128xf32> to vector<32x128xbf16>
    %cst_21 = arith.constant dense<0.000000e+00> : vector<32x128xf32>
    %45 = tpu.matmul %43, %44, %cst_21 {dimension_numbers = #tpu.dot_dimension_numbers<[1], [0], [0], [1], [0, 0, 1, 1], [], []>} : vector<32x32xbf16>, vector<32x128xbf16>, vector<32x128xf32> -> vector<32x128xf32>
    %46 = arith.truncf %45 : vector<32x128xf32> to vector<32x128xbf16>
    %c3 = arith.constant 3 : index
    %c0_22 = arith.constant 0 : index
    %c0_23 = arith.constant 0 : index
    %47 = vector.load %arg2[%c3, %c0_22, %c0_23] : memref<15x128x128xbf16, #tpu.memory_space<vmem>>, vector<1x128x128xbf16>
    %48 = vector.shape_cast %47 : vector<1x128x128xbf16> to vector<128x128xbf16>
    %cst_24 = arith.constant dense<0.000000e+00> : vector<32x128xf32>
    %49 = tpu.matmul %46, %48, %cst_24 {dimension_numbers = #tpu.dot_dimension_numbers<[1], [0], [0], [1], [0, 0, 1, 1], [], []>} : vector<32x128xbf16>, vector<128x128xbf16>, vector<32x128xf32> -> vector<32x128xf32>
    %c1_i32_25 = arith.constant 1 : i32
    %50 = tpu.dynamic_rotate %49 by %c1_i32_25 dim 0 : vector<32x128xf32>, i32 -> vector<32x128xf32>
    %51 = vector.broadcast %14 : vector<32x1xf32> to vector<32x128xf32>
    %52 = arith.mulf %50, %51 : vector<32x128xf32>
    %c4 = arith.constant 4 : index
    %c0_26 = arith.constant 0 : index
    %c0_27 = arith.constant 0 : index
    %53 = vector.load %arg2[%c4, %c0_26, %c0_27] : memref<15x128x128xbf16, #tpu.memory_space<vmem>>, vector<1x128x128xbf16>
    %54 = vector.shape_cast %53 : vector<1x128x128xbf16> to vector<128x128xbf16>
    %cst_28 = arith.constant dense<0.000000e+00> : vector<32x128xf32>
    %55 = tpu.matmul %46, %54, %cst_28 {dimension_numbers = #tpu.dot_dimension_numbers<[1], [0], [0], [1], [0, 0, 1, 1], [], []>} : vector<32x128xbf16>, vector<128x128xbf16>, vector<32x128xf32> -> vector<32x128xf32>
    %56 = arith.addf %52, %55 : vector<32x128xf32>
    %c5 = arith.constant 5 : index
    %c0_29 = arith.constant 0 : index
    %c0_30 = arith.constant 0 : index
    %57 = vector.load %arg2[%c5, %c0_29, %c0_30] : memref<15x128x128xbf16, #tpu.memory_space<vmem>>, vector<1x128x128xbf16>
    %58 = vector.shape_cast %57 : vector<1x128x128xbf16> to vector<128x128xbf16>
    %cst_31 = arith.constant dense<0.000000e+00> : vector<32x128xf32>
    %59 = tpu.matmul %46, %58, %cst_31 {dimension_numbers = #tpu.dot_dimension_numbers<[1], [0], [0], [1], [0, 0, 1, 1], [], []>} : vector<32x128xbf16>, vector<128x128xbf16>, vector<32x128xf32> -> vector<32x128xf32>
    %c31_i32_32 = arith.constant 31 : i32
    %60 = tpu.dynamic_rotate %59 by %c31_i32_32 dim 0 : vector<32x128xf32>, i32 -> vector<32x128xf32>
    %61 = vector.broadcast %33 : vector<32x1xf32> to vector<32x128xf32>
    %62 = arith.mulf %60, %61 : vector<32x128xf32>
    %63 = arith.addf %56, %62 : vector<32x128xf32>
    %c1_33 = arith.constant 1 : index
    %c0_34 = arith.constant 0 : index
    %64 = vector.load %arg3[%c1_33, %c0_34] : memref<8x128xf32, #tpu.memory_space<vmem>>, vector<1x128xf32>
    %65 = vector.broadcast %64 : vector<1x128xf32> to vector<32x128xf32>
    %66 = arith.addf %63, %65 : vector<32x128xf32>
    %cst_35 = arith.constant 0.000000e+00 : f32
    %67 = vector.broadcast %cst_35 : f32 to vector<32x128xf32>
    %68 = arith.maximumf %66, %67 : vector<32x128xf32>
    %c1_36 = arith.constant 1 : index
    %c0_37 = arith.constant 0 : index
    %c0_38 = arith.constant 0 : index
    %69 = vector.load %arg4[%c1_36, %c0_37, %c0_38] : memref<4x32x32xbf16, #tpu.memory_space<vmem>>, vector<1x32x32xbf16>
    %70 = vector.shape_cast %69 : vector<1x32x32xbf16> to vector<32x32xbf16>
    %71 = arith.truncf %68 : vector<32x128xf32> to vector<32x128xbf16>
    %cst_39 = arith.constant dense<0.000000e+00> : vector<32x128xf32>
    %72 = tpu.matmul %70, %71, %cst_39 {dimension_numbers = #tpu.dot_dimension_numbers<[1], [0], [0], [1], [0, 0, 1, 1], [], []>} : vector<32x32xbf16>, vector<32x128xbf16>, vector<32x128xf32> -> vector<32x128xf32>
    %73 = arith.truncf %72 : vector<32x128xf32> to vector<32x128xbf16>
    %c2_40 = arith.constant 2 : index
    %c0_41 = arith.constant 0 : index
    %c0_42 = arith.constant 0 : index
    %74 = vector.load %arg4[%c2_40, %c0_41, %c0_42] : memref<4x32x32xbf16, #tpu.memory_space<vmem>>, vector<1x32x32xbf16>
    %75 = vector.shape_cast %74 : vector<1x32x32xbf16> to vector<32x32xbf16>
    %cst_43 = arith.constant dense<0.000000e+00> : vector<32x128xf32>
    %76 = tpu.matmul %75, %73, %cst_43 {dimension_numbers = #tpu.dot_dimension_numbers<[1], [0], [0], [1], [0, 0, 1, 1], [], []>} : vector<32x32xbf16>, vector<32x128xbf16>, vector<32x128xf32> -> vector<32x128xf32>
    %77 = arith.truncf %76 : vector<32x128xf32> to vector<32x128xbf16>
    %c6 = arith.constant 6 : index
    %c0_44 = arith.constant 0 : index
    %c0_45 = arith.constant 0 : index
    %78 = vector.load %arg2[%c6, %c0_44, %c0_45] : memref<15x128x128xbf16, #tpu.memory_space<vmem>>, vector<1x128x128xbf16>
    %79 = vector.shape_cast %78 : vector<1x128x128xbf16> to vector<128x128xbf16>
    %cst_46 = arith.constant dense<0.000000e+00> : vector<32x128xf32>
    %80 = tpu.matmul %77, %79, %cst_46 {dimension_numbers = #tpu.dot_dimension_numbers<[1], [0], [0], [1], [0, 0, 1, 1], [], []>} : vector<32x128xbf16>, vector<128x128xbf16>, vector<32x128xf32> -> vector<32x128xf32>
    %c31_i32_47 = arith.constant 31 : i32
    %81 = tpu.dynamic_rotate %80 by %c31_i32_47 dim 0 : vector<32x128xf32>, i32 -> vector<32x128xf32>
    %82 = vector.broadcast %33 : vector<32x1xf32> to vector<32x128xf32>
    %83 = arith.mulf %81, %82 : vector<32x128xf32>
    %c7 = arith.constant 7 : index
    %c0_48 = arith.constant 0 : index
    %c0_49 = arith.constant 0 : index
    %84 = vector.load %arg2[%c7, %c0_48, %c0_49] : memref<15x128x128xbf16, #tpu.memory_space<vmem>>, vector<1x128x128xbf16>
    %85 = vector.shape_cast %84 : vector<1x128x128xbf16> to vector<128x128xbf16>
    %cst_50 = arith.constant dense<0.000000e+00> : vector<32x128xf32>
    %86 = tpu.matmul %77, %85, %cst_50 {dimension_numbers = #tpu.dot_dimension_numbers<[1], [0], [0], [1], [0, 0, 1, 1], [], []>} : vector<32x128xbf16>, vector<128x128xbf16>, vector<32x128xf32> -> vector<32x128xf32>
    %87 = arith.addf %83, %86 : vector<32x128xf32>
    %c8 = arith.constant 8 : index
    %c0_51 = arith.constant 0 : index
    %c0_52 = arith.constant 0 : index
    %88 = vector.load %arg2[%c8, %c0_51, %c0_52] : memref<15x128x128xbf16, #tpu.memory_space<vmem>>, vector<1x128x128xbf16>
    %89 = vector.shape_cast %88 : vector<1x128x128xbf16> to vector<128x128xbf16>
    %cst_53 = arith.constant dense<0.000000e+00> : vector<32x128xf32>
    %90 = tpu.matmul %77, %89, %cst_53 {dimension_numbers = #tpu.dot_dimension_numbers<[1], [0], [0], [1], [0, 0, 1, 1], [], []>} : vector<32x128xbf16>, vector<128x128xbf16>, vector<32x128xf32> -> vector<32x128xf32>
    %c1_i32_54 = arith.constant 1 : i32
    %91 = tpu.dynamic_rotate %90 by %c1_i32_54 dim 0 : vector<32x128xf32>, i32 -> vector<32x128xf32>
    %92 = vector.broadcast %14 : vector<32x1xf32> to vector<32x128xf32>
    %93 = arith.mulf %91, %92 : vector<32x128xf32>
    %94 = arith.addf %87, %93 : vector<32x128xf32>
    %c2_55 = arith.constant 2 : index
    %c0_56 = arith.constant 0 : index
    %95 = vector.load %arg3[%c2_55, %c0_56] : memref<8x128xf32, #tpu.memory_space<vmem>>, vector<1x128xf32>
    %96 = vector.broadcast %95 : vector<1x128xf32> to vector<32x128xf32>
    %97 = arith.addf %94, %96 : vector<32x128xf32>
    %cst_57 = arith.constant 0.000000e+00 : f32
    %98 = vector.broadcast %cst_57 : f32 to vector<32x128xf32>
    %99 = arith.maximumf %97, %98 : vector<32x128xf32>
    %c8_i32 = arith.constant 8 : i32
    %100 = vector.broadcast %c8_i32 : i32 to vector<32x1xi32>
    %101 = arith.cmpi slt, %0, %100 : vector<32x1xi32>
    %102 = arith.extui %101 : vector<32x1xi1> to vector<32x1xi32>
    %103 = arith.sitofp %102 : vector<32x1xi32> to vector<32x1xf32>
    %104 = vector.broadcast %103 : vector<32x1xf32> to vector<32x128xf32>
    %105 = arith.mulf %99, %104 : vector<32x128xf32>
    %106 = arith.truncf %105 : vector<32x128xf32> to vector<32x128xbf16>
    %c3_58 = arith.constant 3 : index
    %c0_59 = arith.constant 0 : index
    %c0_60 = arith.constant 0 : index
    %107 = vector.load %arg4[%c3_58, %c0_59, %c0_60] : memref<4x32x32xbf16, #tpu.memory_space<vmem>>, vector<1x32x32xbf16>
    %108 = vector.shape_cast %107 : vector<1x32x32xbf16> to vector<32x32xbf16>
    %cst_61 = arith.constant dense<0.000000e+00> : vector<32x128xf32>
    %109 = tpu.matmul %108, %106, %cst_61 {dimension_numbers = #tpu.dot_dimension_numbers<[1], [0], [0], [1], [0, 0, 1, 1], [], []>} : vector<32x32xbf16>, vector<32x128xbf16>, vector<32x128xf32> -> vector<32x128xf32>
    %110 = arith.truncf %109 : vector<32x128xf32> to vector<32x128xbf16>
    %c9 = arith.constant 9 : index
    %c0_62 = arith.constant 0 : index
    %c0_63 = arith.constant 0 : index
    %111 = vector.load %arg2[%c9, %c0_62, %c0_63] : memref<15x128x128xbf16, #tpu.memory_space<vmem>>, vector<1x128x128xbf16>
    %112 = vector.shape_cast %111 : vector<1x128x128xbf16> to vector<128x128xbf16>
    %cst_64 = arith.constant dense<0.000000e+00> : vector<32x128xf32>
    %113 = tpu.matmul %110, %112, %cst_64 {dimension_numbers = #tpu.dot_dimension_numbers<[1], [0], [0], [1], [0, 0, 1, 1], [], []>} : vector<32x128xbf16>, vector<128x128xbf16>, vector<32x128xf32> -> vector<32x128xf32>
    %c31_i32_65 = arith.constant 31 : i32
    %114 = tpu.dynamic_rotate %113 by %c31_i32_65 dim 0 : vector<32x128xf32>, i32 -> vector<32x128xf32>
    %115 = vector.broadcast %33 : vector<32x1xf32> to vector<32x128xf32>
    %116 = arith.mulf %114, %115 : vector<32x128xf32>
    %c10 = arith.constant 10 : index
    %c0_66 = arith.constant 0 : index
    %c0_67 = arith.constant 0 : index
    %117 = vector.load %arg2[%c10, %c0_66, %c0_67] : memref<15x128x128xbf16, #tpu.memory_space<vmem>>, vector<1x128x128xbf16>
    %118 = vector.shape_cast %117 : vector<1x128x128xbf16> to vector<128x128xbf16>
    %cst_68 = arith.constant dense<0.000000e+00> : vector<32x128xf32>
    %119 = tpu.matmul %110, %118, %cst_68 {dimension_numbers = #tpu.dot_dimension_numbers<[1], [0], [0], [1], [0, 0, 1, 1], [], []>} : vector<32x128xbf16>, vector<128x128xbf16>, vector<32x128xf32> -> vector<32x128xf32>
    %120 = arith.addf %116, %119 : vector<32x128xf32>
    %c11 = arith.constant 11 : index
    %c0_69 = arith.constant 0 : index
    %c0_70 = arith.constant 0 : index
    %121 = vector.load %arg2[%c11, %c0_69, %c0_70] : memref<15x128x128xbf16, #tpu.memory_space<vmem>>, vector<1x128x128xbf16>
    %122 = vector.shape_cast %121 : vector<1x128x128xbf16> to vector<128x128xbf16>
    %cst_71 = arith.constant dense<0.000000e+00> : vector<32x128xf32>
    %123 = tpu.matmul %110, %122, %cst_71 {dimension_numbers = #tpu.dot_dimension_numbers<[1], [0], [0], [1], [0, 0, 1, 1], [], []>} : vector<32x128xbf16>, vector<128x128xbf16>, vector<32x128xf32> -> vector<32x128xf32>
    %c1_i32_72 = arith.constant 1 : i32
    %124 = tpu.dynamic_rotate %123 by %c1_i32_72 dim 0 : vector<32x128xf32>, i32 -> vector<32x128xf32>
    %125 = vector.broadcast %14 : vector<32x1xf32> to vector<32x128xf32>
    %126 = arith.mulf %124, %125 : vector<32x128xf32>
    %127 = arith.addf %120, %126 : vector<32x128xf32>
    %c3_73 = arith.constant 3 : index
    %c0_74 = arith.constant 0 : index
    %128 = vector.load %arg3[%c3_73, %c0_74] : memref<8x128xf32, #tpu.memory_space<vmem>>, vector<1x128xf32>
    %129 = vector.broadcast %128 : vector<1x128xf32> to vector<32x128xf32>
    %130 = arith.addf %127, %129 : vector<32x128xf32>
    %cst_75 = arith.constant 0.000000e+00 : f32
    %131 = vector.broadcast %cst_75 : f32 to vector<32x128xf32>
    %132 = arith.maximumf %130, %131 : vector<32x128xf32>
    %c16_i32_76 = arith.constant 16 : i32
    %133 = vector.broadcast %c16_i32_76 : i32 to vector<32x1xi32>
    %134 = arith.cmpi slt, %0, %133 : vector<32x1xi32>
    %135 = arith.extui %134 : vector<32x1xi1> to vector<32x1xi32>
    %136 = arith.sitofp %135 : vector<32x1xi32> to vector<32x1xf32>
    %137 = vector.broadcast %136 : vector<32x1xf32> to vector<32x128xf32>
    %138 = arith.mulf %132, %137 : vector<32x128xf32>
    %139 = arith.truncf %138 : vector<32x128xf32> to vector<32x128xbf16>
    %c12 = arith.constant 12 : index
    %c0_77 = arith.constant 0 : index
    %c0_78 = arith.constant 0 : index
    %140 = vector.load %arg2[%c12, %c0_77, %c0_78] : memref<15x128x128xbf16, #tpu.memory_space<vmem>>, vector<1x128x128xbf16>
    %141 = vector.shape_cast %140 : vector<1x128x128xbf16> to vector<128x128xbf16>
    %cst_79 = arith.constant dense<0.000000e+00> : vector<32x128xf32>
    %142 = tpu.matmul %139, %141, %cst_79 {dimension_numbers = #tpu.dot_dimension_numbers<[1], [0], [0], [1], [0, 0, 1, 1], [], []>} : vector<32x128xbf16>, vector<128x128xbf16>, vector<32x128xf32> -> vector<32x128xf32>
    %c31_i32_80 = arith.constant 31 : i32
    %143 = tpu.dynamic_rotate %142 by %c31_i32_80 dim 0 : vector<32x128xf32>, i32 -> vector<32x128xf32>
    %144 = vector.broadcast %33 : vector<32x1xf32> to vector<32x128xf32>
    %145 = arith.mulf %143, %144 : vector<32x128xf32>
    %c13 = arith.constant 13 : index
    %c0_81 = arith.constant 0 : index
    %c0_82 = arith.constant 0 : index
    %146 = vector.load %arg2[%c13, %c0_81, %c0_82] : memref<15x128x128xbf16, #tpu.memory_space<vmem>>, vector<1x128x128xbf16>
    %147 = vector.shape_cast %146 : vector<1x128x128xbf16> to vector<128x128xbf16>
    %cst_83 = arith.constant dense<0.000000e+00> : vector<32x128xf32>
    %148 = tpu.matmul %139, %147, %cst_83 {dimension_numbers = #tpu.dot_dimension_numbers<[1], [0], [0], [1], [0, 0, 1, 1], [], []>} : vector<32x128xbf16>, vector<128x128xbf16>, vector<32x128xf32> -> vector<32x128xf32>
    %149 = arith.addf %145, %148 : vector<32x128xf32>
    %c14 = arith.constant 14 : index
    %c0_84 = arith.constant 0 : index
    %c0_85 = arith.constant 0 : index
    %150 = vector.load %arg2[%c14, %c0_84, %c0_85] : memref<15x128x128xbf16, #tpu.memory_space<vmem>>, vector<1x128x128xbf16>
    %151 = vector.shape_cast %150 : vector<1x128x128xbf16> to vector<128x128xbf16>
    %cst_86 = arith.constant dense<0.000000e+00> : vector<32x128xf32>
    %152 = tpu.matmul %139, %151, %cst_86 {dimension_numbers = #tpu.dot_dimension_numbers<[1], [0], [0], [1], [0, 0, 1, 1], [], []>} : vector<32x128xbf16>, vector<128x128xbf16>, vector<32x128xf32> -> vector<32x128xf32>
    %c1_i32_87 = arith.constant 1 : i32
    %153 = tpu.dynamic_rotate %152 by %c1_i32_87 dim 0 : vector<32x128xf32>, i32 -> vector<32x128xf32>
    %154 = vector.broadcast %14 : vector<32x1xf32> to vector<32x128xf32>
    %155 = arith.mulf %153, %154 : vector<32x128xf32>
    %156 = arith.addf %149, %155 : vector<32x128xf32>
    %c4_88 = arith.constant 4 : index
    %c0_89 = arith.constant 0 : index
    %157 = vector.load %arg3[%c4_88, %c0_89] : memref<8x128xf32, #tpu.memory_space<vmem>>, vector<1x128xf32>
    %158 = vector.broadcast %157 : vector<1x128xf32> to vector<32x128xf32>
    %159 = arith.addf %156, %158 : vector<32x128xf32>
    %c16_i32_90 = arith.constant 16 : i32
    %160 = vector.broadcast %c16_i32_90 : i32 to vector<32x1xi32>
    %161 = arith.cmpi slt, %0, %160 : vector<32x1xi32>
    %162 = arith.extui %161 : vector<32x1xi1> to vector<32x1xi32>
    %163 = arith.sitofp %162 : vector<32x1xi32> to vector<32x1xf32>
    %164 = vector.broadcast %163 : vector<32x1xf32> to vector<32x128xf32>
    %165 = arith.mulf %159, %164 : vector<32x128xf32>
    %c0_91 = arith.constant 0 : index
    %c0_92 = arith.constant 0 : index
    %166 = vector.load %arg6[%c0_91, %c0_92] : memref<32x128xf32, #tpu.memory_space<vmem>>, vector<32x128xf32>
    tpu.vector_store %arg6[%c0_91, %c0_92], %165 {strides = array<i32>} : memref<32x128xf32, #tpu.memory_space<vmem>>, vector<32x128xf32>,
    return
  }
  func.func @transform_0(%arg0: i32) -> (i32, i32) {
    %c0_i32 = arith.constant 0 : i32
    %c0_i32_0 = arith.constant 0 : i32
    return %arg0, %c0_i32 : i32, i32
  }
  func.func @transform_1(%arg0: i32) -> (i32, i32, i32) {
    %c0_i32 = arith.constant 0 : i32
    %c0_i32_0 = arith.constant 0 : i32
    %c0_i32_1 = arith.constant 0 : i32
    %c0_i32_2 = arith.constant 0 : i32
    return %c0_i32, %c0_i32_0, %c0_i32_1 : i32, i32, i32
  }
  func.func @transform_2(%arg0: i32) -> (i32, i32) {
    %c0_i32 = arith.constant 0 : i32
    %c0_i32_0 = arith.constant 0 : i32
    %c0_i32_1 = arith.constant 0 : i32
    return %c0_i32, %c0_i32_0 : i32, i32
  }
  func.func @transform_3(%arg0: i32) -> (i32, i32, i32) {
    %c0_i32 = arith.constant 0 : i32
    %c0_i32_0 = arith.constant 0 : i32
    %c0_i32_1 = arith.constant 0 : i32
    %c0_i32_2 = arith.constant 0 : i32
    return %c0_i32, %c0_i32_0, %c0_i32_1 : i32, i32, i32
  }
  func.func @transform_4(%arg0: i32) -> (i32, i32) {
    %c0_i32 = arith.constant 0 : i32
    %c0_i32_0 = arith.constant 0 : i32
    %c0_i32_1 = arith.constant 0 : i32
    return %c0_i32, %c0_i32_0 : i32, i32
  }
  func.func @transform_5(%arg0: i32) -> (i32, i32) {
    %c0_i32 = arith.constant 0 : i32
    %c0_i32_0 = arith.constant 0 : i32
    return %arg0, %c0_i32 : i32, i32
  }
}

</mosaic_0001>

<bundles_post_ra>
// kernel: conv_autoencoder_forward.1
= control target key start
LH: loop header
LB: loop body
LE: loop exit
PB: predicated region body
PF: predicated region fallthrough
CT: control target
= control target key end

     0   :  { %v2834_v23 = vmov 0.0   ;;  %v2835_v33 = vmov 0   ;;  %s3515_s1 = inlined_call_operand.vmem [shape: bf16[15,128,128], index: 1, kind: input, shape index: {}]   ;;  %s3516_s4 = inlined_call_operand.vmem [shape: s32[32,1], index: 4, kind: input, shape index: {}]   ;;  %s3517_s0 = inlined_call_operand.vmem [shape: bf16[32,128], index: 0, kind: input, shape index: {}]   ;;  %s3518_s2 = inlined_call_operand.vmem [shape: f32[8,128], index: 2, kind: input, shape index: {}]   ;;  %s3519_s3 = inlined_call_operand.vmem [shape: bf16[4,32,32], index: 3, kind: input, shape index: {}]   ;;  %s3520_s5 = inlined_call_operand.vmem [shape: f32[32,128], index: 5, kind: output, shape index: {}]  }
   0x1   :  { %v2647_v0 = vld [vmem:[%s3515_s1 + $0x38] sm:$0xff]  ;;  %v2646_v3 = vld [vmem:[%s3515_s1 + $0x30] sm:$0xff]  ;;  %v2645_v6 = vld [vmem:[%s3515_s1 + $0x28] sm:$0xff]  ;;  %2797 = vset.pattern.permute.xlu1 %v2835_v33  ;;  %2786 = vset.pattern.permute.xlu0 %v2835_v33 }
   0x2   :  { %v2663_v1 = vld [vmem:[%s3515_s1 + $0xb8] sm:$0xff]  ;;  %105 = vmatpush.bf16.msra.mxu0 %v2647_v0  ;;  %v2662_v4 = vld [vmem:[%s3515_s1 + $0xb0] sm:$0xff]  ;;  %v2661_v7 = vld [vmem:[%s3515_s1 + $0xa8] sm:$0xff]  ;;  %2808 = vset.pattern.permute.xlu2 %v2835_v33 }
   0x3   :  { %v2655_v2 = vld [vmem:[%s3515_s1 + $0x78] sm:$0xff]  ;;  %336 = vmatpush.bf16.msra.mxu2 %v2663_v1  ;;  %v2654_v5 = vld [vmem:[%s3515_s1 + $0x70] sm:$0xff]  ;;  %v2653_v8 = vld [vmem:[%s3515_s1 + $0x68] sm:$0xff]  ;;  %v128_v1 = vlaneseq }
   0x4   :  { %248 = vmatpush.bf16.msra.mxu1 %v2655_v2  ;;  %v2644_v9 = vld [vmem:[%s3515_s1 + $0x20] sm:$0xff]  ;;  %v2905_v12 = vld [vmem:[%s3516_s4 + $0x10] sm:$0xff]  ;;  %v2910_v13 = vld [vmem:[%s3516_s4 + $0x18] sm:$0xff] }
   0x5   :  { %v2660_v10 = vld [vmem:[%s3515_s1 + $0xa0] sm:$0xff]  ;;  %v137_v15 = vadd.s32 4294967295, %v2905_v12  ;;  %v138_v16 = vadd.s32 4294967295, %v2910_v13  ;;  %v2922_v17 = vld [vmem:[%s3516_s4 + $0x8] sm:$0xff]  ;;  %v2643_v20 = vld [vmem:[%s3515_s1 + $0x18] sm:$0xff]  ;;  %v366_v30 = vadd.s32 1, %v2905_v12 }
   0x6   :  { %106 = vmatpush.bf16.msra.mxu0 %v2646_v3  ;;  %v2652_v11 = vld [vmem:[%s3515_s1 + $0x60] sm:$0xff]  ;;  %v136_v19 = vadd.s32 4294967295, %v2922_v17  ;;  %v2659_v21 = vld [vmem:[%s3515_s1 + $0x98] sm:$0xff]  ;;  %v2642_v26 = vld [vmem:[%s3515_s1 + $0x10] sm:$0xff]  ;;  %v367_v31 = vadd.s32 1, %v2910_v13  ;;  %v365_v36 = vadd.s32 1, %v2922_v17 }
   0x7   :  { %337 = vmatpush.bf16.msra.mxu2 %v2662_v4  ;;  %v2915_v14 = vld [vmem:[%s3516_s4] sm:$0xff]  ;;  %vm141_vm0 = vcmp.ge.s32.totalorder %v137_v15, 0  ;;  %vm142_vm1 = vcmp.ge.s32.totalorder %v138_v16, 0  ;;  %vm145_vm2 = vcmp.lt.s32.totalorder %v137_v15, 16  ;;  %vm146_vm3 = vcmp.lt.s32.totalorder %v138_v16, 16  ;;  %v2651_v22 = vld [vmem:[%s3515_s1 + $0x58] sm:$0xff] }
   0x8   :  { %249 = vmatpush.bf16.msra.mxu1 %v2654_v5  ;;  %v135_v18 = vadd.s32 4294967295, %v2915_v14  ;;  %vm149_vm4 = vmand %vm141_vm0, %vm145_vm2  ;;  %vm140_vm6 = vcmp.ge.s32.totalorder %v136_v19, 0  ;;  %vm144_vm9 = vcmp.lt.s32.totalorder %v136_v19, 16  ;;  %v2658_v27 = vld [vmem:[%s3515_s1 + $0x90] sm:$0xff]  ;;  %v364_v35 = vadd.s32 1, %v2915_v14  ;;  %v2641_v38 = vld [vmem:[%s3515_s1 + $0x8] sm:$0xff] }
   0x9   :  { %vm150_vm8 = vmand %vm142_vm1, %vm146_vm3  ;;  %v1900_v24 = vsel %vm149_vm4, 1.0, %v2834_v23  ;;  %v2650_v32 = vld [vmem:[%s3515_s1 + $0x50] sm:$0xff]  ;;  %vm370_vm12 = vcmp.ge.s32.totalorder %v366_v30, 0  ;;  %vm371_vm13 = vcmp.ge.s32.totalorder %v367_v31, 0  ;;  %vm374_vm14 = vcmp.lt.s32.totalorder %v366_v30, 16  ;;  %v2657_v39 = vld [vmem:[%s3515_s1 + $0x88] sm:$0xff] }
   0xa   :  { %107 = vmatpush.bf16.msra.mxu0 %v2645_v6  ;;  %vm139_vm5 = vcmp.ge.s32.totalorder %v135_v18, 0  ;;  %vm143_vm7 = vcmp.lt.s32.totalorder %v135_v18, 16  ;;  %v1901_v25 = vsel %vm150_vm8, 1.0, %v2834_v23  ;;  %vm148_vm11 = vmand %vm140_vm6, %vm144_vm9  ;;  %vm375_vm15 = vcmp.lt.s32.totalorder %v367_v31, 16  ;;  %v2649_v41 = vld [vmem:[%s3515_s1 + $0x48] sm:$0xff]  ;;  %v2640_v46 = vld [vmem:[%s3515_s1] sm:$0xff] }
   0xb   :  { %338 = vmatpush.bf16.msra.mxu2 %v2661_v7  ;;  %vm147_vm10 = vmand %vm139_vm5, %vm143_vm7  ;;  %v2787_v28 = vpack.i.bf16 %v1901_v25, %v1900_v24  ;;  %v1899_v34 = vsel %vm148_vm11, 1.0, %v2834_v23  ;;  %vm368_vm1 = vcmp.ge.s32.totalorder %v364_v35, 0  ;;  %vm369_vm2 = vcmp.ge.s32.totalorder %v365_v36, 0  ;;  %v2656_v47 = vld [vmem:[%s3515_s1 + $0x80] sm:$0xff]  ;;  %v2639_v57 = vld [vmem:[%s3517_s0 + $0x8] sm:$0xff] }
   0xc   :  { %250 = vmatpush.bf16.msra.mxu1 %v2653_v8  ;;  %v1898_v29 = vsel %vm147_vm10, 1.0, %v2834_v23  ;;  %vm378_vm0 = vmand %vm370_vm12, %vm374_vm14  ;;  %vm372_vm3 = vcmp.lt.s32.totalorder %v364_v35, 16  ;;  %vm373_vm5 = vcmp.lt.s32.totalorder %v365_v36, 16  ;;  %v2648_v48 = vld [vmem:[%s3515_s1 + $0x40] sm:$0xff]  ;;  %vm1518_vm8 = vcmp.lt.s32.totalorder %v2915_v14, 16 }
   0xd   :  { %v2798_v37 = vpack.i.bf16 %v1899_v34, %v1898_v29  ;;  %2788 = vperm.xlu0 %2786, %v2787_v28   ;;  %vm379_vm4 = vmand %vm371_vm13, %vm375_vm15  ;;  %v2000_v40 = vsel %vm378_vm0, 1.0, %v2834_v23  ;;  %vm1519_vm9 = vcmp.lt.s32.totalorder %v2922_v17, 16  ;;  %v2638_v50 = vld [vmem:[%s3517_s0] sm:$0xff]  ;;  %vm1520_vm10 = vcmp.lt.s32.totalorder %v2905_v12, 16 }
   0xe   :  { %108 = vmatpush.bf16.msra.mxu0 %v2644_v9  ;;  %v2001_v42 = vsel %vm379_vm4, 1.0, %v2834_v23  ;;  %vm376_vm6 = vmand %vm368_vm1, %vm372_vm3  ;;  %vm1521_vm11 = vcmp.lt.s32.totalorder %v2910_v13, 16  ;;  %v2490_v51 = vsel %vm1518_vm8, 1.0, %v2834_v23  ;;  %v2491_v52 = vsel %vm1519_vm9, 1.0, %v2834_v23 }
   0xf   :  { %339 = vmatpush.bf16.msra.mxu2 %v2660_v10  ;;  %2799 = vperm.xlu1 %2797, %v2798_v37   ;;  %vm377_vm7 = vmand %vm369_vm2, %vm373_vm5  ;;  %v1998_v43 = vsel %vm376_vm6, 1.0, %v2834_v23  ;;  %v2792_v44 = vpack.i.bf16 %v2001_v42, %v2000_v40  ;;  %v2492_v53 = vsel %vm1520_vm10, 1.0, %v2834_v23  ;;  %v2493_v54 = vsel %vm1521_vm11, 1.0, %v2834_v23 }
  0x10   :  { %251 = vmatpush.bf16.msra.mxu1 %v2652_v11  ;;  %v1999_v45 = vsel %vm377_vm7, 1.0, %v2834_v23  ;;  %v2819_v55 = vpack.i.bf16 %v2491_v52, %v2490_v51  ;;  %v2824_v56 = vpack.i.bf16 %v2493_v54, %v2492_v53  ;;  %v2988_v3 = vshrl.u32 %v128_v1, 7  ;;  %v2681_v54 = vld [vmem:[%s3515_s1 + $0x138] sm:$0xff] }
  0x11   :  { %v2803_v49 = vpack.i.bf16 %v1999_v45, %v1998_v43  ;;  %vm442_vm14 = vcmask 261120   ;;  %vm1146_vm15 = vcmp.lt.s32.totalorder %v2905_v12, 8  ;;  %vm1147_vm0 = vcmp.lt.s32.totalorder %v2910_v13, 8 }
  0x12   :  { %109 = vmatpush.bf16.msra.mxu0 %v2643_v20  ;;  %vm130_vm12 = vcmp.lt.s32.totalorder %v2988_v3, 1  ;;  %vm359_vm13 = vcmp.lt.s32.totalorder %v2988_v3, 7  ;;  %vm1144_vm1 = vcmp.lt.s32.totalorder %v2915_v14, 8  ;;  %vm1145_vm2 = vcmp.lt.s32.totalorder %v2922_v17, 8 }
  0x13   :  { %340 = vmatpush.bf16.msra.mxu2 %v2659_v21 }
  0x14   :  { %252 = vmatpush.bf16.msra.mxu1 %v2651_v22 }
  0x15   :  { %2793 = vperm.xlu0 %2786, %v2792_v44  }
  0x16   :  { %110 = vmatpush.bf16.msra.mxu0 %v2642_v26 }
  0x17   :  { %341 = vmatpush.bf16.msra.mxu2 %v2658_v27  ;;  %2804 = vperm.xlu1 %2797, %v2803_v49  }
  0x18   :  { %253 = vmatpush.bf16.msra.mxu1 %v2650_v32 }
  0x1a   :  { %111 = vmatpush.bf16.msra.mxu0 %v2641_v38 }
  0x1b   :  { %342 = vmatpush.bf16.msra.mxu2 %v2657_v39 }
  0x1c   :  { %254 = vmatpush.bf16.msra.mxu1 %v2649_v41 }
  0x1d   :  { %2820 = vperm.xlu0 %2786, %v2819_v55   ;;  %v2689_v55 = vld [vmem:[%s3515_s1 + $0x178] sm:$0xff] }
  0x1e   :  { %112 = vmatpush.bf16.msra.mxu0 %v2640_v46 }
  0x1f   :  { %343 = vmatpush.bf16.msra.mxu2 %v2656_v47  ;;  %2825 = vperm.xlu1 %2797, %v2824_v56  }
  0x20   :  { %255 = vmatpush.bf16.msra.mxu1 %v2648_v48 }
  0x21   :  { %113 = vmatmul.bf16.vlgmr.msra.gmra.mxu0 %v2638_v50 }
  0x22   :  { %344 = vmatmul.bf16.vlgmr.msra.gmra.mxu2 %v2638_v50  ;;  %631 = vmatpush.bf16.msrb.mxu0 %v2681_v54 }
  0x23   :  { %256 = vmatmul.bf16.vlgmr.msra.gmra.mxu1 %v2638_v50 }
  0x24   :  { %719 = vmatpush.bf16.msrb.mxu1 %v2689_v55 }
  0x31   :  { %118 = vmatmul.bf16.gmra.mxu0 %v2639_v57 }
  0x32   :  { %349 = vmatmul.bf16.gmra.mxu2 %v2639_v57 }
  0x33   :  { %261 = vmatmul.bf16.gmra.mxu1 %v2639_v57 }
  0x7f   :  { %v2789_v4 = vpop.permute.xlu0 %2788 }
  0x80   :  { %v2991_v10 = vunpack.i.l.bf16 %v2789_v4  ;;  %v3006_v28 = vunpack.i.h.bf16 %v2789_v4 }
  0x81   :  { %v2800_v0 = vpop.permute.xlu1 %2799 }
  0x82   :  { %v2993_v11 = vunpack.i.l.bf16 %v2800_v0  ;;  %v2995_v16 = vunpack.i.h.bf16 %v2800_v0 }
  0x87   :  { %v2794_v39 = vpop.permute.xlu0 %2793 }
  0x88   :  { %v3020_v41 = vunpack.i.h.bf16 %v2794_v39  ;;  %v3022_v42 = vunpack.i.l.bf16 %v2794_v39  ;;  %v2666_v39 = vld [vmem:[%s3515_s1 + $0xc0] sm:$0xff] }
  0x89   :  { %v2805_v19 = vpop.permute.xlu1 %2804 }
  0x8a   :  { %v3008_v29 = vunpack.i.h.bf16 %v2805_v19  ;;  %v3010_v30 = vunpack.i.l.bf16 %v2805_v19 }
  0x9e   :  { %v114_v58 = vpop.f32.mrf.mxu0 }
  0x9f   :  { %v124_v9 = vrot.slane %v114_v58, 7  ;;  %v2829_v58 = vld [vmem:[%s3518_s2] ss:$0 sm:$0xff] }
  0xa0   :  { %v257_v59 = vpop.f32.mrf.mxu1 }
  0xa5   :  { %v345_v60 = vpop.f32.mrf.mxu2 }
  0xa6   :  { %v116_v61 = vpop.f32.mrf.mxu0  ;;  %v355_v25 = vrot.slane %v345_v60, 1  ;;  %v2680_v60 = vld [vmem:[%s3515_s1 + $0x130] sm:$0xff] }
  0xa7   :  { %v125_v5 = vrot.slane %v116_v61, 7  ;;  %v2688_v61 = vld [vmem:[%s3515_s1 + $0x170] sm:$0xff]  ;;  %632 = vmatpush.bf16.msrb.mxu0 %v2680_v60 }
  0xa8   :  { %v259_v62 = vpop.f32.mrf.mxu1  ;;  %720 = vmatpush.bf16.msrb.mxu1 %v2688_v61 }
  0xa9   :  { %v133_v22 = vsel %vm130_vm12, %v124_v9, %v125_v5 }
  0xaa   :  { %v180_v32 = vmul.f32 %v2995_v16, %v133_v22  ;;  %v2672_v22 = vld [vmem:[%s3515_s1 + $0xf0] sm:$0xff] }
  0xac   :  { %v268_v45 = vadd.f32 %v259_v62, %v180_v32  ;;  %v2665_v32 = vld [vmem:[%s3519_s3 + $0x8] sm:$0xff] }
  0xad   :  { %v347_v63 = vpop.f32.mrf.mxu2 }
  0xae   :  { %v119_v2 = vpop.f32.mrf.mxu0  ;;  %v356_v18 = vrot.slane %v347_v63, 1 }
  0xaf   :  { %v126_v6 = vrot.slane %v119_v2, 7 }
  0xb0   :  { %v262_v8 = vpop.f32.mrf.mxu1  ;;  %v362_v33 = vsel %vm359_vm13, %v355_v25, %v356_v18 }
  0xb1   :  { %v132_v24 = vsel %vm130_vm12, %v125_v5, %v126_v6  ;;  %v408_v44 = vmul.f32 %v3010_v30, %v362_v33  ;;  %v2679_v5 = vld [vmem:[%s3515_s1 + $0x128] sm:$0xff]  ;;  %v2668_v33 = vld [vmem:[%s3515_s1 + $0xd0] sm:$0xff] }
  0xb2   :  { %v181_v34 = vmul.f32 %v2991_v10, %v132_v24  ;;  %633 = vmatpush.bf16.msrb.mxu0 %v2679_v5  ;;  %v2677_v24 = vld [vmem:[%s3515_s1 + $0x118] sm:$0xff] }
  0xb4   :  { %v269_v46 = vadd.f32 %v262_v8, %v181_v34  ;;  %v2676_v34 = vld [vmem:[%s3515_s1 + $0x110] sm:$0xff] }
  0xb5   :  { %v350_v7 = vpop.f32.mrf.mxu2 }
  0xb6   :  { %v121_v15 = vpop.f32.mrf.mxu0  ;;  %v357_v20 = vrot.slane %v350_v7, 1 }
  0xb7   :  { %v127_v21 = vrot.slane %v121_v15, 7  ;;  %v2673_v15 = vld [vmem:[%s3515_s1 + $0xf8] sm:$0xff] }
  0xb8   :  { %v361_v35 = vsel %vm359_vm13, %v356_v18, %v357_v20  ;;  %v264_v47 = vpop.f32.mrf.mxu1  ;;  %v2678_v18 = vld [vmem:[%s3515_s1 + $0x120] sm:$0xff] }
  0xb9   :  { %v134_v26 = vsel %vm130_vm12, %v127_v21, %v124_v9  ;;  %v131_v27 = vsel %vm130_vm12, %v126_v6, %v127_v21  ;;  %v409_v43 = vmul.f32 %v3008_v29, %v361_v35  ;;  %v2687_v6 = vld [vmem:[%s3515_s1 + $0x168] sm:$0xff]  ;;  %v2664_v21 = vld [vmem:[%s3519_s3] sm:$0xff]  ;;  %634 = vmatpush.bf16.msrb.mxu0 %v2678_v18  ;;  %v2684_v35 = vld [vmem:[%s3515_s1 + $0x150] sm:$0xff] }
  0xba   :  { %v179_v31 = vmul.f32 %v2993_v11, %v134_v26  ;;  %v182_v36 = vmul.f32 %v3006_v28, %v131_v27  ;;  %721 = vmatpush.bf16.msrb.mxu1 %v2687_v6  ;;  %v2671_v26 = vld [vmem:[%s3515_s1 + $0xe8] sm:$0xff]  ;;  %v2670_v27 = vld [vmem:[%s3515_s1 + $0xe0] sm:$0xff] }
  0xbc   :  { %v267_v38 = vadd.f32 %v257_v59, %v179_v31  ;;  %v270_v50 = vadd.f32 %v264_v47, %v182_v36  ;;  %v413_v59 = vadd.f32 %v409_v43, %v268_v45  ;;  %v2669_v31 = vld [vmem:[%s3515_s1 + $0xd8] sm:$0xff]  ;;  %v2667_v36 = vld [vmem:[%s3515_s1 + $0xc8] sm:$0xff]  ;;  %v2682_v43 = vld [vmem:[%s3515_s1 + $0x140] sm:$0xff] }
  0xbd   :  { %v352_v37 = vpop.f32.mrf.mxu2  ;;  %635 = vmatpush.bf16.msrb.mxu0 %v2677_v24 }
  0xbe   :  { %v358_v40 = vrot.slane %v352_v37, 1  ;;  %v412_v53 = vadd.f32 %v408_v44, %v267_v38  ;;  %v419_v4 = vadd.f32 %v2829_v58, %v413_v59  ;;  %v2675_v37 = vld [vmem:[%s3515_s1 + $0x108] sm:$0xff] }
  0xbf   :  { %v2683_v38 = vld [vmem:[%s3515_s1 + $0x148] sm:$0xff] }
  0xc0   :  { %v360_v48 = vsel %vm359_vm13, %v357_v20, %v358_v40  ;;  %v363_v49 = vsel %vm359_vm13, %v358_v40, %v355_v25  ;;  %v418_v0 = vadd.f32 %v2829_v58, %v412_v53  ;;  %v423_v9 = vmax.f32 %v419_v4, 0.0  ;;  %v2686_v20 = vld [vmem:[%s3515_s1 + $0x160] sm:$0xff]  ;;  %v2685_v25 = vld [vmem:[%s3515_s1 + $0x158] sm:$0xff] }
  0xc1   :  { %v410_v51 = vmul.f32 %v3022_v42, %v360_v48  ;;  %v411_v52 = vmul.f32 %v3020_v41, %v363_v49  ;;  %722 = vmatpush.bf16.msrb.mxu1 %v2686_v20  ;;  %636 = vmatpush.bf16.msrb.mxu0 %v2676_v34  ;;  %v2674_v40 = vld [vmem:[%s3515_s1 + $0x100] sm:$0xff] }
  0xc2   :  { %v422_v8 = vmax.f32 %v418_v0, 0.0 }
  0xc3   :  { %v414_v56 = vadd.f32 %v410_v51, %v269_v46  ;;  %v415_v57 = vadd.f32 %v411_v52, %v270_v50 }
  0xc4   :  { %v430_v19 = vpack.c.bf16 %v423_v9, %v422_v8 }
  0xc5   :  { %v420_v62 = vadd.f32 %v2829_v58, %v414_v56  ;;  %v421_v63 = vadd.f32 %v2829_v58, %v415_v57  ;;  %723 = vmatpush.bf16.msrb.mxu1 %v2685_v25  ;;  %637 = vmatpush.bf16.msrb.mxu0 %v2675_v37 }
  0xc7   :  { %v424_v1 = vmax.f32 %v420_v62, 0.0  ;;  %v425_v2 = vmax.f32 %v421_v63, 0.0 }
  0xc9   :  { %v431_v7 = vpack.c.bf16 %v425_v2, %v424_v1  ;;  %724 = vmatpush.bf16.msrb.mxu1 %v2684_v35  ;;  %638 = vmatpush.bf16.msrb.mxu0 %v2674_v40 }
  0xcb   :  { %455 = vmatpush.bf16.msra.mxu3 %v431_v7 }
  0xcd   :  { %725 = vmatpush.bf16.msrb.mxu1 %v2683_v38  ;;  %v2830_v38 = vld [vmem:[%s3518_s2 + $0x1] ss:$0 sm:$0xff] }
  0xcf   :  { %456 = vmatpush.bf16.msra.mxu3 %v430_v19 }
  0xd1   :  { %726 = vmatpush.bf16.msrb.mxu1 %v2682_v43 }
  0xd2   :  { %2010 = vmatmul.msk.bf16.vlgmr.msra.gmra.mxu3 %vm442_vm14, %v2664_v21 }
  0xd3   :  { %535 = vmatpush.bf16.msrb.mxu3 %v2673_v15 }
  0xd7   :  { %536 = vmatpush.bf16.msrb.mxu3 %v2672_v22 }
  0xdb   :  { %537 = vmatpush.bf16.msrb.mxu3 %v2671_v26 }
  0xdf   :  { %538 = vmatpush.bf16.msrb.mxu3 %v2670_v27 }
  0xe2   :  { %2011 = vmatmul.msk.bf16.gmra.mxu3 %vm442_vm14, %v2665_v32 }
  0xe3   :  { %539 = vmatpush.bf16.msrb.mxu3 %v2669_v31 }
  0xe7   :  { %540 = vmatpush.bf16.msrb.mxu3 %v2668_v33 }
  0xeb   :  { %541 = vmatpush.bf16.msrb.mxu3 %v2667_v36 }
  0xef   :  { %542 = vmatpush.bf16.msrb.mxu3 %v2666_v39 }
 0x155   :  { %v458_v44 = vpop.f32.mrf.mxu3 }
 0x15d   :  { %v460_v45 = vpop.f32.mrf.mxu3 }
 0x15e   :  { %v468_v46 = vpack.c.bf16 %v460_v45, %v458_v44 }
 0x160   :  { %543 = vmatmul.bf16.vlgmr.msrb.gmra.mxu3 %v468_v46  ;;  %639 = vmatmul.bf16.vlgmr.msrb.gmra.mxu0 %v468_v46 }
 0x161   :  { %727 = vmatmul.bf16.vlgmr.msrb.gmra.mxu1 %v468_v46 }
 0x165   :  { %v463_v47 = vpop.f32.mrf.mxu3 }
 0x16d   :  { %v465_v48 = vpop.f32.mrf.mxu3 }
 0x16e   :  { %v469_v49 = vpack.c.bf16 %v465_v48, %v463_v47 }
 0x170   :  { %548 = vmatmul.bf16.gmra.mxu3 %v469_v49  ;;  %644 = vmatmul.bf16.gmra.mxu0 %v469_v49 }
 0x171   :  { %732 = vmatmul.bf16.gmra.mxu1 %v469_v49 }
 0x1dd   :  { %v640_v51 = vpop.f32.mrf.mxu0 }
 0x1de   :  { %v728_v50 = vpop.f32.mrf.mxu1 }
 0x1df   :  { %v738_v8 = vrot.slane %v728_v50, 1 }
 0x1e3   :  { %v544_v52 = vpop.f32.mrf.mxu3 }
 0x1e4   :  { %v554_v60 = vrot.slane %v544_v52, 7 }
 0x1e5   :  { %v642_v55 = vpop.f32.mrf.mxu0 }
 0x1e6   :  { %v730_v53 = vpop.f32.mrf.mxu1 }
 0x1e7   :  { %v739_v5 = vrot.slane %v730_v53, 1 }
 0x1e9   :  { %v744_v21 = vsel %vm359_vm13, %v738_v8, %v739_v5 }
 0x1ea   :  { %v746_v35 = vmul.f32 %v3010_v30, %v744_v21  ;;  %v2705_v21 = vld [vmem:[%s3515_s1 + $0x1d8] sm:$0xff] }
 0x1eb   :  { %v546_v54 = vpop.f32.mrf.mxu3 }
 0x1ec   :  { %v555_v57 = vrot.slane %v546_v54, 7 }
 0x1ed   :  { %v645_v61 = vpop.f32.mrf.mxu0 }
 0x1ee   :  { %v733_v56 = vpop.f32.mrf.mxu1  ;;  %v560_v0 = vsel %vm130_vm12, %v554_v60, %v555_v57 }
 0x1ef   :  { %v740_v1 = vrot.slane %v733_v56, 1  ;;  %v563_v7 = vmul.f32 %v2995_v16, %v560_v0  ;;  %v2690_v56 = vld [vmem:[%s3519_s3 + $0x10] sm:$0xff] }
 0x1f0   :  { %v2708_v0 = vld [vmem:[%s3515_s1 + $0x1f0] sm:$0xff] }
 0x1f1   :  { %v743_v19 = vsel %vm359_vm13, %v739_v5, %v740_v1  ;;  %v651_v26 = vadd.f32 %v642_v55, %v563_v7  ;;  %v2707_v5 = vld [vmem:[%s3515_s1 + $0x1e8] sm:$0xff] }
 0x1f2   :  { %v747_v27 = vmul.f32 %v3008_v29, %v743_v19  ;;  %v2715_v7 = vld [vmem:[%s3515_s1 + $0x228] sm:$0xff]  ;;  %v2692_v19 = vld [vmem:[%s3519_s3 + $0x20] sm:$0xff] }
 0x1f3   :  { %v549_v58 = vpop.f32.mrf.mxu3 }
 0x1f4   :  { %v556_v59 = vrot.slane %v549_v58, 7  ;;  %v751_v45 = vadd.f32 %v747_v27, %v651_v26  ;;  %v2704_v26 = vld [vmem:[%s3515_s1 + $0x1d0] sm:$0xff] }
 0x1f5   :  { %v647_v34 = vpop.f32.mrf.mxu0  ;;  %v2712_v27 = vld [vmem:[%s3515_s1 + $0x210] sm:$0xff] }
 0x1f6   :  { %v559_v62 = vsel %vm130_vm12, %v555_v57, %v556_v59  ;;  %v735_v63 = vpop.f32.mrf.mxu1  ;;  %v757_v50 = vadd.f32 %v2830_v38, %v751_v45 }
 0x1f7   :  { %v564_v2 = vmul.f32 %v2991_v10, %v559_v62  ;;  %v741_v4 = vrot.slane %v735_v63, 1  ;;  %v2717_v62 = vld [vmem:[%s3515_s1 + $0x238] sm:$0xff]  ;;  %v2700_v63 = vld [vmem:[%s3515_s1 + $0x1b0] sm:$0xff] }
 0x1f8   :  { %v761_v54 = vmax.f32 %v757_v50, 0.0 }
 0x1f9   :  { %v742_v6 = vsel %vm359_vm13, %v740_v1, %v741_v4  ;;  %v652_v18 = vadd.f32 %v645_v61, %v564_v2  ;;  %v745_v22 = vsel %vm359_vm13, %v741_v4, %v738_v8  ;;  %v2709_v61 = vld [vmem:[%s3515_s1 + $0x1f8] sm:$0xff]  ;;  %v2716_v1 = vld [vmem:[%s3515_s1 + $0x230] sm:$0xff]  ;;  %v2699_v4 = vld [vmem:[%s3515_s1 + $0x1a8] sm:$0xff] }
 0x1fa   :  { %v748_v9 = vmul.f32 %v3022_v42, %v742_v6  ;;  %v749_v36 = vmul.f32 %v3020_v41, %v745_v22  ;;  %1011 = vmatpush.bf16.msra.mxu1 %v2709_v61  ;;  %v2698_v8 = vld [vmem:[%s3515_s1 + $0x1a0] sm:$0xff]  ;;  %v2713_v22 = vld [vmem:[%s3515_s1 + $0x218] sm:$0xff] }
 0x1fb   :  { %v551_v15 = vpop.f32.mrf.mxu3 }
 0x1fc   :  { %v557_v20 = vrot.slane %v551_v15, 7  ;;  %v752_v33 = vadd.f32 %v748_v9, %v652_v18  ;;  %v2706_v9 = vld [vmem:[%s3515_s1 + $0x1e0] sm:$0xff] }
 0x1fd   :  { %v2714_v18 = vld [vmem:[%s3515_s1 + $0x220] sm:$0xff] }
 0x1fe   :  { %v558_v24 = vsel %vm130_vm12, %v556_v59, %v557_v20  ;;  %v561_v25 = vsel %vm130_vm12, %v557_v20, %v554_v60  ;;  %v758_v43 = vadd.f32 %v2830_v38, %v752_v33  ;;  %v2701_v60 = vld [vmem:[%s3515_s1 + $0x1b8] sm:$0xff]  ;;  %1012 = vmatpush.bf16.msra.mxu1 %v2708_v0  ;;  %v2711_v33 = vld [vmem:[%s3515_s1 + $0x208] sm:$0xff] }
 0x1ff   :  { %v562_v31 = vmul.f32 %v2993_v11, %v561_v25  ;;  %v565_v32 = vmul.f32 %v3006_v28, %v558_v24  ;;  %915 = vmatpush.bf16.msra.mxu0 %v2701_v60  ;;  %v2697_v20 = vld [vmem:[%s3515_s1 + $0x198] sm:$0xff]  ;;  %v2693_v24 = vld [vmem:[%s3519_s3 + $0x28] sm:$0xff]  ;;  %v2696_v25 = vld [vmem:[%s3515_s1 + $0x190] sm:$0xff] }
 0x200   :  { %v762_v48 = vmax.f32 %v758_v43, 0.0  ;;  %v2328_v43 = vsel %vm1144_vm1, 1.0, %v2834_v23 }
 0x201   :  { %v653_v37 = vadd.f32 %v647_v34, %v565_v32  ;;  %v650_v39 = vadd.f32 %v640_v51, %v562_v31  ;;  %v2691_v51 = vld [vmem:[%s3519_s3 + $0x18] sm:$0xff]  ;;  %v2695_v31 = vld [vmem:[%s3515_s1 + $0x188] sm:$0xff]  ;;  %v2694_v34 = vld [vmem:[%s3515_s1 + $0x180] sm:$0xff] }
 0x202   :  { %1013 = vmatpush.bf16.msra.mxu1 %v2707_v5  ;;  %v2703_v32 = vld [vmem:[%s3515_s1 + $0x1c8] sm:$0xff] }
 0x203   :  { %v753_v40 = vadd.f32 %v749_v36, %v653_v37  ;;  %v750_v44 = vadd.f32 %v746_v35, %v650_v39  ;;  %916 = vmatpush.bf16.msra.mxu0 %v2700_v63  ;;  %v2702_v35 = vld [vmem:[%s3515_s1 + $0x1c0] sm:$0xff]  ;;  %v2330_v37 = vsel %vm1146_vm15, 1.0, %v2834_v23 }
 0x204   :  { %v2710_v36 = vld [vmem:[%s3515_s1 + $0x200] sm:$0xff] }
 0x205   :  { %v759_v46 = vadd.f32 %v2830_v38, %v753_v40  ;;  %v756_v47 = vadd.f32 %v2830_v38, %v750_v44  ;;  %v2331_v38 = vsel %vm1147_vm0, 1.0, %v2834_v23  ;;  %v2329_v44 = vsel %vm1145_vm2, 1.0, %v2834_v23 }
 0x206   :  { %1014 = vmatpush.bf16.msra.mxu1 %v2706_v9  ;;  %v2809_v39 = vpack.i.bf16 %v2331_v38, %v2330_v37  ;;  %v2814_v45 = vpack.i.bf16 %v2329_v44, %v2328_v43  ;;  %v2727_v44 = vld [vmem:[%s3515_s1 + $0x278] sm:$0xff] }
 0x207   :  { %v763_v49 = vmax.f32 %v759_v46, 0.0  ;;  %v760_v53 = vmax.f32 %v756_v47, 0.0  ;;  %917 = vmatpush.bf16.msra.mxu0 %v2699_v4 }
 0x208   :  { %2810 = vperm.xlu2 %2808, %v2809_v39  }
 0x209   :  { %v770_v52 = vpack.c.bf16 %v763_v49, %v762_v48  ;;  %v769_v55 = vpack.c.bf16 %v761_v54, %v760_v53 }
 0x20a   :  { %1015 = vmatpush.bf16.msra.mxu1 %v2705_v21 }
 0x20b   :  { %793 = vmatpush.bf16.msrb.mxu2 %v770_v52  ;;  %918 = vmatpush.bf16.msra.mxu0 %v2698_v8 }
 0x20e   :  { %1016 = vmatpush.bf16.msra.mxu1 %v2704_v26  ;;  %v2831_v26 = vld [vmem:[%s3518_s2 + $0x2] ss:$0 sm:$0xff] }
 0x20f   :  { %794 = vmatpush.bf16.msrb.mxu2 %v769_v55  ;;  %919 = vmatpush.bf16.msra.mxu0 %v2697_v20 }
 0x210   :  { %2815 = vperm.xlu2 %2808, %v2814_v45   ;;  %v2743_v45 = vld [vmem:[%s3515_s1 + $0x2f8] sm:$0xff] }
 0x212   :  { %2168 = vmatmul.msk.bf16.vlgmr.msrb.gmra.mxu2 %vm442_vm14, %v2690_v56  ;;  %1017 = vmatpush.bf16.msra.mxu1 %v2703_v32 }
 0x213   :  { %1099 = vmatpush.bf16.msra.mxu2 %v2717_v62  ;;  %920 = vmatpush.bf16.msra.mxu0 %v2696_v25 }
 0x216   :  { %1018 = vmatpush.bf16.msra.mxu1 %v2702_v35 }
 0x217   :  { %1100 = vmatpush.bf16.msra.mxu2 %v2716_v1  ;;  %921 = vmatpush.bf16.msra.mxu0 %v2695_v31 }
 0x21b   :  { %1101 = vmatpush.bf16.msra.mxu2 %v2715_v7  ;;  %922 = vmatpush.bf16.msra.mxu0 %v2694_v34 }
 0x21f   :  { %1102 = vmatpush.bf16.msra.mxu2 %v2714_v18  ;;  %1289 = vmatpush.bf16.msrb.mxu0 %v2727_v44  ;;  %v2749_v44 = vld [vmem:[%s3515_s1 + $0x328] sm:$0xff] }
 0x222   :  { %2169 = vmatmul.msk.bf16.gmra.mxu2 %vm442_vm14, %v2691_v51 }
 0x223   :  { %1103 = vmatpush.bf16.msra.mxu2 %v2713_v22 }
 0x227   :  { %1104 = vmatpush.bf16.msra.mxu2 %v2712_v27 }
 0x22b   :  { %1105 = vmatpush.bf16.msra.mxu2 %v2711_v33 }
 0x22f   :  { %1106 = vmatpush.bf16.msra.mxu2 %v2710_v36 }
 0x233   :  { %1473 = vmatpush.bf16.msrb.mxu2 %v2743_v45  ;;  %v2757_v45 = vld [vmem:[%s3515_s1 + $0x368] sm:$0xff] }
 0x262   :  { %v2811_v8 = vpop.permute.xlu2 %2810 }
 0x263   :  { %v2812_v43 = vunpack.i.l.bf16 %v2811_v8 }
 0x295   :  { %v796_v57 = vpop.f32.mrf.mxu2 }
 0x29d   :  { %v798_v58 = vpop.f32.mrf.mxu2 }
 0x29e   :  { %v806_v15 = vpack.c.bf16 %v798_v58, %v796_v57 }
 0x2a5   :  { %v801_v59 = vpop.f32.mrf.mxu2 }
 0x2ad   :  { %v803_v2 = vpop.f32.mrf.mxu2 }
 0x2ae   :  { %v807_v6 = vpack.c.bf16 %v803_v2, %v801_v59 }
 0x2b0   :  { %835 = vmatpush.bf16.msra.mxu3 %v807_v6 }
 0x2b4   :  { %836 = vmatpush.bf16.msra.mxu3 %v806_v15 }
 0x2b7   :  { %2182 = vmatmul.msk.bf16.vlgmr.msra.gmra.mxu3 %vm442_vm14, %v2692_v19 }
 0x2c7   :  { %2183 = vmatmul.msk.bf16.gmra.mxu3 %vm442_vm14, %v2693_v24 }
 0x33a   :  { %v838_v40 = vpop.f32.mrf.mxu3 }
 0x342   :  { %v840_v46 = vpop.f32.mrf.mxu3 }
 0x343   :  { %v848_v12 = vpack.c.bf16 %v840_v46, %v838_v40  ;;  %v2816_v46 = vpop.permute.xlu2 %2815 }
 0x345   :  { %923 = vmatmul.bf16.vlgmr.msra.gmra.mxu0 %v848_v12  ;;  %1019 = vmatmul.bf16.vlgmr.msra.gmra.mxu1 %v848_v12 }
 0x346   :  { %1107 = vmatmul.bf16.vlgmr.msra.gmra.mxu2 %v848_v12 }
 0x34a   :  { %v843_v13 = vpop.f32.mrf.mxu3 }
 0x352   :  { %v845_v47 = vpop.f32.mrf.mxu3 }
 0x353   :  { %v849_v48 = vpack.c.bf16 %v845_v47, %v843_v13 }
 0x355   :  { %928 = vmatmul.bf16.gmra.mxu0 %v849_v48  ;;  %1024 = vmatmul.bf16.gmra.mxu1 %v849_v48 }
 0x356   :  { %1112 = vmatmul.bf16.gmra.mxu2 %v849_v48 }
 0x3c2   :  { %v924_v14 = vpop.f32.mrf.mxu0  ;;  %v1020_v17 = vpop.f32.mrf.mxu1 }
 0x3c3   :  { %v934_v60 = vrot.slane %v924_v14, 1  ;;  %v2735_v14 = vld [vmem:[%s3515_s1 + $0x2b8] sm:$0xff] }
 0x3c4   :  { %1385 = vmatpush.bf16.msrb.mxu1 %v2735_v14  ;;  %v2755_v14 = vld [vmem:[%s3515_s1 + $0x358] sm:$0xff] }
 0x3c9   :  { %v1108_v49 = vpop.f32.mrf.mxu2 }
 0x3ca   :  { %v926_v50 = vpop.f32.mrf.mxu0  ;;  %v1022_v52 = vpop.f32.mrf.mxu1  ;;  %v1118_v0 = vrot.slane %v1108_v49, 7  ;;  %v2742_v49 = vld [vmem:[%s3515_s1 + $0x2f0] sm:$0xff] }
 0x3cb   :  { %v935_v55 = vrot.slane %v926_v50, 1  ;;  %v2813_v50 = vunpack.i.h.bf16 %v2811_v8  ;;  %1474 = vmatpush.bf16.msrb.mxu2 %v2742_v49  ;;  %v2719_v8 = vld [vmem:[%s3519_s3 + $0x38] sm:$0xff] }
 0x3cd   :  { %v940_v1 = vsel %vm359_vm13, %v934_v60, %v935_v55 }
 0x3ce   :  { %v942_v9 = vmul.f32 %v3010_v30, %v940_v1  ;;  %v2740_v1 = vld [vmem:[%s3515_s1 + $0x2e0] sm:$0xff] }
 0x3d0   :  { %v1030_v27 = vadd.f32 %v1020_v17, %v942_v9  ;;  %v2726_v17 = vld [vmem:[%s3515_s1 + $0x270] sm:$0xff]  ;;  %v2731_v9 = vld [vmem:[%s3515_s1 + $0x298] sm:$0xff] }
 0x3d1   :  { %v1110_v53 = vpop.f32.mrf.mxu2  ;;  %1290 = vmatpush.bf16.msrb.mxu0 %v2726_v17  ;;  %v3390_v17 = vld [vmem:[%s3515_s1 + $0x398] sm:$0xff] }
 0x3d2   :  { %v929_v23 = vpop.f32.mrf.mxu0  ;;  %v1025_v57 = vpop.f32.mrf.mxu1  ;;  %v1119_v61 = vrot.slane %v1110_v53, 7 }
 0x3d3   :  { %v936_v54 = vrot.slane %v929_v23, 1  ;;  %v2734_v23 = vld [vmem:[%s3515_s1 + $0x2b0] sm:$0xff] }
 0x3d4   :  { %v1124_v7 = vsel %vm130_vm12, %v1118_v0, %v1119_v61  ;;  %1386 = vmatpush.bf16.msrb.mxu1 %v2734_v23 }
 0x3d5   :  { %v939_v56 = vsel %vm359_vm13, %v935_v55, %v936_v54  ;;  %v1127_v22 = vmul.f32 %v2995_v16, %v1124_v7  ;;  %v2817_v55 = vunpack.i.l.bf16 %v2816_v46  ;;  %v2739_v7 = vld [vmem:[%s3515_s1 + $0x2d8] sm:$0xff] }
 0x3d6   :  { %v943_v63 = vmul.f32 %v3008_v29, %v939_v56 }
 0x3d8   :  { %v1031_v15 = vadd.f32 %v1022_v52, %v943_v63 }
 0x3d9   :  { %v1113_v51 = vpop.f32.mrf.mxu2 }
 0x3da   :  { %v1120_v58 = vrot.slane %v1113_v51, 7  ;;  %v931_v59 = vpop.f32.mrf.mxu0  ;;  %v1027_v31 = vpop.f32.mrf.mxu1  ;;  %v1131_v32 = vadd.f32 %v1127_v22, %v1031_v15  ;;  %v2722_v15 = vld [vmem:[%s3515_s1 + $0x250] sm:$0xff]  ;;  %v2729_v22 = vld [vmem:[%s3515_s1 + $0x288] sm:$0xff] }
 0x3db   :  { %v937_v62 = vrot.slane %v931_v59, 1  ;;  %v2741_v59 = vld [vmem:[%s3515_s1 + $0x2e8] sm:$0xff] }
 0x3dc   :  { %v1123_v2 = vsel %vm130_vm12, %v1119_v61, %v1120_v58  ;;  %v1137_v12 = vadd.f32 %v2831_v26, %v1131_v32  ;;  %1475 = vmatpush.bf16.msrb.mxu2 %v2741_v59  ;;  %v2752_v59 = vld [vmem:[%s3515_s1 + $0x340] sm:$0xff] }
 0x3dd   :  { %v938_v4 = vsel %vm359_vm13, %v936_v54, %v937_v62  ;;  %v941_v6 = vsel %vm359_vm13, %v937_v62, %v934_v60  ;;  %v1128_v18 = vmul.f32 %v2991_v10, %v1123_v2  ;;  %v2818_v54 = vunpack.i.h.bf16 %v2816_v46  ;;  %v2733_v62 = vld [vmem:[%s3515_s1 + $0x2a8] sm:$0xff] }
 0x3de   :  { %v944_v5 = vmul.f32 %v3022_v42, %v938_v4  ;;  %v945_v20 = vmul.f32 %v3020_v41, %v941_v6  ;;  %v1141_v56 = vmax.f32 %v1137_v12, 0.0  ;;  %1387 = vmatpush.bf16.msrb.mxu1 %v2733_v62  ;;  %v2732_v4 = vld [vmem:[%s3515_s1 + $0x2a0] sm:$0xff]  ;;  %v2723_v6 = vld [vmem:[%s3515_s1 + $0x258] sm:$0xff]  ;;  %v2765_v46 = vld [vmem:[%s3515_s1 + $0x3a8] sm:$0xff] }
 0x3df   :  { %v2748_v12 = vld [vmem:[%s3515_s1 + $0x320] sm:$0xff] }
 0x3e0   :  { %v1032_v19 = vadd.f32 %v1025_v57, %v944_v5  ;;  %v1033_v35 = vadd.f32 %v1027_v31, %v945_v20  ;;  %v1177_v63 = vmul.f32 %v2818_v54, %v1141_v56  ;;  %v2718_v5 = vld [vmem:[%s3519_s3 + $0x30] sm:$0xff]  ;;  %1476 = vmatpush.bf16.msrb.mxu2 %v2740_v1  ;;  %v2721_v20 = vld [vmem:[%s3515_s1 + $0x248] sm:$0xff] }
 0x3e1   :  { %v1115_v21 = vpop.f32.mrf.mxu2  ;;  %v2753_v56 = vld [vmem:[%s3515_s1 + $0x348] sm:$0xff] }
 0x3e2   :  { %v1132_v24 = vadd.f32 %v1128_v18, %v1032_v19  ;;  %v1121_v25 = vrot.slane %v1115_v21, 7  ;;  %1388 = vmatpush.bf16.msrb.mxu1 %v2732_v4  ;;  %v2738_v18 = vld [vmem:[%s3515_s1 + $0x2d0] sm:$0xff]  ;;  %v2737_v21 = vld [vmem:[%s3515_s1 + $0x2c8] sm:$0xff] }
 0x3e3   :  { %v2730_v19 = vld [vmem:[%s3515_s1 + $0x290] sm:$0xff] }
 0x3e4   :  { %v1122_v33 = vsel %vm130_vm12, %v1120_v58, %v1121_v25  ;;  %v1125_v34 = vsel %vm130_vm12, %v1121_v25, %v1118_v0  ;;  %v1138_v38 = vadd.f32 %v2831_v26, %v1132_v24  ;;  %v2725_v58 = vld [vmem:[%s3515_s1 + $0x268] sm:$0xff]  ;;  %v2724_v0 = vld [vmem:[%s3515_s1 + $0x260] sm:$0xff]  ;;  %1477 = vmatpush.bf16.msrb.mxu2 %v2739_v7 }
 0x3e5   :  { %v1126_v36 = vmul.f32 %v2993_v11, %v1125_v34  ;;  %v1129_v37 = vmul.f32 %v3006_v28, %v1122_v33  ;;  %1291 = vmatpush.bf16.msrb.mxu0 %v2725_v58  ;;  %v2720_v24 = vld [vmem:[%s3515_s1 + $0x240] sm:$0xff] }
 0x3e6   :  { %v1142_v47 = vmax.f32 %v1138_v38, 0.0  ;;  %1389 = vmatpush.bf16.msrb.mxu1 %v2731_v9  ;;  %v2736_v25 = vld [vmem:[%s3515_s1 + $0x2c0] sm:$0xff]  ;;  %v2767_v38 = vld [vmem:[%s3515_s1 + $0x3b8] sm:$0xff] }
 0x3e7   :  { %v1130_v39 = vadd.f32 %v1126_v36, %v1030_v27  ;;  %v1133_v40 = vadd.f32 %v1129_v37, %v1033_v35  ;;  %v2751_v36 = vld [vmem:[%s3515_s1 + $0x338] sm:$0xff]  ;;  %v2744_v58 = vld [vmem:[%s3515_s1 + $0x300] sm:$0xff] }
 0x3e8   :  { %v1178_v51 = vmul.f32 %v2812_v43, %v1142_v47  ;;  %1478 = vmatpush.bf16.msrb.mxu2 %v2738_v18  ;;  %v2759_v37 = vld [vmem:[%s3515_s1 + $0x378] sm:$0xff]  ;;  %v2766_v43 = vld [vmem:[%s3515_s1 + $0x3b0] sm:$0xff]  ;;  %v2764_v47 = vld [vmem:[%s3515_s1 + $0x3a0] sm:$0xff] }
 0x3e9   :  { %v1139_v13 = vadd.f32 %v2831_v26, %v1133_v40  ;;  %v1136_v48 = vadd.f32 %v2831_v26, %v1130_v39  ;;  %1292 = vmatpush.bf16.msrb.mxu0 %v2724_v0  ;;  %v2728_v26 = vld [vmem:[%s3515_s1 + $0x280] sm:$0xff]  ;;  %v2750_v39 = vld [vmem:[%s3515_s1 + $0x330] sm:$0xff] }
 0x3ea   :  { %1390 = vmatpush.bf16.msrb.mxu1 %v2730_v19  ;;  %v2758_v40 = vld [vmem:[%s3515_s1 + $0x370] sm:$0xff] }
 0x3eb   :  { %v1143_v52 = vmax.f32 %v1139_v13, 0.0  ;;  %v1140_v53 = vmax.f32 %v1136_v48, 0.0  ;;  %v2756_v13 = vld [vmem:[%s3515_s1 + $0x360] sm:$0xff]  ;;  %v2747_v48 = vld [vmem:[%s3515_s1 + $0x318] sm:$0xff] }
 0x3ec   :  { %1479 = vmatpush.bf16.msrb.mxu2 %v2737_v21 }
 0x3ed   :  { %v1179_v57 = vmul.f32 %v2813_v50, %v1143_v52  ;;  %v1176_v61 = vmul.f32 %v2817_v55, %v1140_v53  ;;  %1293 = vmatpush.bf16.msrb.mxu0 %v2723_v6  ;;  %v2746_v50 = vld [vmem:[%s3515_s1 + $0x310] sm:$0xff]  ;;  %v2745_v55 = vld [vmem:[%s3515_s1 + $0x308] sm:$0xff] }
 0x3ee   :  { %1391 = vmatpush.bf16.msrb.mxu1 %v2729_v22  ;;  %v2754_v52 = vld [vmem:[%s3515_s1 + $0x350] sm:$0xff] }
 0x3ef   :  { %v1181_v60 = vpack.c.bf16 %v1179_v57, %v1178_v51  ;;  %v1180_v2 = vpack.c.bf16 %v1177_v63, %v1176_v61  ;;  %v3402_v53 = vld [vmem:[%s3515_s1 + $0x390] sm:$0xff]  ;;  %v3414_v51 = vld [vmem:[%s3515_s1 + $0x388] sm:$0xff] }
 0x3f0   :  { %1480 = vmatpush.bf16.msrb.mxu2 %v2736_v25 }
 0x3f1   :  { %1209 = vmatpush.bf16.msrb.mxu3 %v1181_v60  ;;  %1294 = vmatpush.bf16.msrb.mxu0 %v2722_v15  ;;  %v3426_v60 = vld [vmem:[%s3515_s1 + $0x380] sm:$0xff] }
 0x3f2   :  { %1392 = vmatpush.bf16.msrb.mxu1 %v2728_v26 }
 0x3f4   :  { %2768 = vmatpush.bf16.msra.mxu2 %v2759_v37 }
 0x3f5   :  { %1210 = vmatpush.bf16.msrb.mxu3 %v1180_v2  ;;  %1295 = vmatpush.bf16.msrb.mxu0 %v2721_v20 }
 0x3f6   :  { %1805 = vmatpush.bf16.msra.mxu1 %v2767_v38 }
 0x3f8   :  { %2344 = vmatmul.msk.bf16.vlgmr.msrb.gmra.mxu3 %vm442_vm14, %v2718_v5  ;;  %2769 = vmatpush.bf16.msra.mxu2 %v2758_v40 }
 0x3f9   :  { %1296 = vmatpush.bf16.msrb.mxu0 %v2720_v24  ;;  %1621 = vmatpush.bf16.msra.mxu3 %v2751_v36 }
 0x3fa   :  { %1806 = vmatpush.bf16.msra.mxu1 %v2766_v43 }
 0x3fc   :  { %2770 = vmatpush.bf16.msra.mxu2 %v2757_v45 }
 0x3fd   :  { %1717 = vmatpush.bf16.msra.mxu0 %v2759_v37  ;;  %1622 = vmatpush.bf16.msra.mxu3 %v2750_v39 }
 0x3fe   :  { %1807 = vmatpush.bf16.msra.mxu1 %v2765_v46 }
 0x400   :  { %2771 = vmatpush.bf16.msra.mxu2 %v2756_v13 }
 0x401   :  { %1718 = vmatpush.bf16.msra.mxu0 %v2758_v40  ;;  %1623 = vmatpush.bf16.msra.mxu3 %v2749_v44 }
 0x402   :  { %1808 = vmatpush.bf16.msra.mxu1 %v2764_v47 }
 0x404   :  { %2772 = vmatpush.bf16.msra.mxu2 %v2755_v14 }
 0x405   :  { %1719 = vmatpush.bf16.msra.mxu0 %v2757_v45  ;;  %1624 = vmatpush.bf16.msra.mxu3 %v2748_v12 }
 0x406   :  { %1809 = vmatpush.bf16.msra.mxu1 %v3390_v17 }
 0x408   :  { %2345 = vmatmul.msk.bf16.gmra.mxu3 %vm442_vm14, %v2719_v8  ;;  %2773 = vmatpush.bf16.msra.mxu2 %v2754_v52 }
 0x409   :  { %1720 = vmatpush.bf16.msra.mxu0 %v2756_v13  ;;  %1625 = vmatpush.bf16.msra.mxu3 %v2747_v48 }
 0x40a   :  { %1810 = vmatpush.bf16.msra.mxu1 %v3402_v53 }
 0x40c   :  { %2774 = vmatpush.bf16.msra.mxu2 %v2753_v56 }
 0x40d   :  { %1721 = vmatpush.bf16.msra.mxu0 %v2755_v14  ;;  %1626 = vmatpush.bf16.msra.mxu3 %v2746_v50 }
 0x40e   :  { %1811 = vmatpush.bf16.msra.mxu1 %v3414_v51 }
 0x410   :  { %2775 = vmatpush.bf16.msra.mxu2 %v2752_v59 }
 0x411   :  { %1722 = vmatpush.bf16.msra.mxu0 %v2754_v52  ;;  %1627 = vmatpush.bf16.msra.mxu3 %v2745_v55  ;;  %v3460_v52 = vpop.permute.xlu1 %2825 }
 0x412   :  { %1812 = vmatpush.bf16.msra.mxu1 %v3426_v60 }
 0x415   :  { %1723 = vmatpush.bf16.msra.mxu0 %v2753_v56  ;;  %1628 = vmatpush.bf16.msra.mxu3 %v2744_v58 }
 0x419   :  { %1724 = vmatpush.bf16.msra.mxu0 %v2752_v59  ;;  %2776 = vmatpush.bf16.msrb.mxu3 %v2767_v38  ;;  %v2828_v59 = vunpack.i.h.bf16 %v3460_v52 }
 0x41d   :  { %2777 = vmatpush.bf16.msrb.mxu3 %v2766_v43 }
 0x421   :  { %2778 = vmatpush.bf16.msrb.mxu3 %v2765_v46 }
 0x425   :  { %2779 = vmatpush.bf16.msrb.mxu3 %v2764_v47 }
 0x429   :  { %2780 = vmatpush.bf16.msrb.mxu3 %v3390_v17  ;;  %v3458_v17 = vpop.permute.xlu0 %2820 }
 0x42a   :  { %v2822_v58 = vunpack.i.l.bf16 %v3458_v17 }
 0x42d   :  { %2781 = vmatpush.bf16.msrb.mxu3 %v3402_v53  ;;  %v2827_v53 = vunpack.i.l.bf16 %v3460_v52 }
 0x431   :  { %2782 = vmatpush.bf16.msrb.mxu3 %v3414_v51 }
 0x435   :  { %2783 = vmatpush.bf16.msrb.mxu3 %v3426_v60 }
 0x47b   :  { %v1212_v27 = vpop.f32.mrf.mxu3 }
 0x483   :  { %v1214_v31 = vpop.f32.mrf.mxu3 }
 0x484   :  { %v1222_v32 = vpack.c.bf16 %v1214_v31, %v1212_v27 }
 0x486   :  { %1297 = vmatmul.bf16.vlgmr.msrb.gmra.mxu0 %v1222_v32  ;;  %1481 = vmatmul.bf16.vlgmr.msrb.gmra.mxu2 %v1222_v32 }
 0x487   :  { %1393 = vmatmul.bf16.vlgmr.msrb.gmra.mxu1 %v1222_v32 }
 0x48b   :  { %v1217_v33 = vpop.f32.mrf.mxu3 }
 0x493   :  { %v1219_v34 = vpop.f32.mrf.mxu3 }
 0x494   :  { %v1223_v35 = vpack.c.bf16 %v1219_v34, %v1217_v33  ;;  %v2832_v34 = vld [vmem:[%s3518_s2 + $0x3] ss:$0 sm:$0xff] }
 0x496   :  { %1302 = vmatmul.bf16.gmra.mxu0 %v1223_v35  ;;  %1486 = vmatmul.bf16.gmra.mxu2 %v1223_v35 }
 0x497   :  { %1398 = vmatmul.bf16.gmra.mxu1 %v1223_v35 }
 0x503   :  { %v1298_v49 = vpop.f32.mrf.mxu0 }
 0x504   :  { %v1394_v23 = vpop.f32.mrf.mxu1  ;;  %v1308_v15 = vrot.slane %v1298_v49, 1 }
 0x509   :  { %v1482_v54 = vpop.f32.mrf.mxu2 }
 0x50a   :  { %v1492_v6 = vrot.slane %v1482_v54, 7 }
 0x50b   :  { %v1300_v57 = vpop.f32.mrf.mxu0 }
 0x50c   :  { %v1396_v61 = vpop.f32.mrf.mxu1  ;;  %v1309_v0 = vrot.slane %v1300_v57, 1  ;;  %v2823_v57 = vunpack.i.h.bf16 %v3458_v17 }
 0x50e   :  { %v1314_v22 = vsel %vm359_vm13, %v1308_v15, %v1309_v0 }
 0x50f   :  { %v1316_v32 = vmul.f32 %v3010_v30, %v1314_v22 }
 0x511   :  { %v1484_v62 = vpop.f32.mrf.mxu2  ;;  %v1404_v43 = vadd.f32 %v1394_v23, %v1316_v32 }
 0x512   :  { %v1493_v4 = vrot.slane %v1484_v62, 7 }
 0x513   :  { %v1303_v63 = vpop.f32.mrf.mxu0 }
 0x514   :  { %v1310_v1 = vrot.slane %v1303_v63, 1  ;;  %v1399_v8 = vpop.f32.mrf.mxu1  ;;  %v1498_v18 = vsel %vm130_vm12, %v1492_v6, %v1493_v4 }
 0x515   :  { %v1501_v24 = vmul.f32 %v2995_v16, %v1498_v18 }
 0x516   :  { %v1313_v2 = vsel %vm359_vm13, %v1309_v0, %v1310_v1 }
 0x517   :  { %v1317_v5 = vmul.f32 %v3008_v29, %v1313_v2 }
 0x519   :  { %v1487_v7 = vpop.f32.mrf.mxu2  ;;  %v1405_v20 = vadd.f32 %v1396_v61, %v1317_v5 }
 0x51a   :  { %v1494_v9 = vrot.slane %v1487_v7, 7 }
 0x51b   :  { %v1305_v19 = vpop.f32.mrf.mxu0  ;;  %v1505_v33 = vadd.f32 %v1501_v24, %v1405_v20 }
 0x51c   :  { %v1311_v21 = vrot.slane %v1305_v19, 1  ;;  %v1497_v25 = vsel %vm130_vm12, %v1493_v4, %v1494_v9  ;;  %v1401_v44 = vpop.f32.mrf.mxu1 }
 0x51d   :  { %v1502_v35 = vmul.f32 %v2991_v10, %v1497_v25  ;;  %v1511_v12 = vadd.f32 %v2832_v34, %v1505_v33 }
 0x51e   :  { %v1312_v26 = vsel %vm359_vm13, %v1310_v1, %v1311_v21  ;;  %v1315_v27 = vsel %vm359_vm13, %v1311_v21, %v1308_v15 }
 0x51f   :  { %v1318_v31 = vmul.f32 %v3022_v42, %v1312_v26  ;;  %v1319_v37 = vmul.f32 %v3020_v41, %v1315_v27  ;;  %v1515_v55 = vmax.f32 %v1511_v12, 0.0 }
 0x521   :  { %v1406_v36 = vadd.f32 %v1399_v8, %v1318_v31  ;;  %v1489_v38 = vpop.f32.mrf.mxu2  ;;  %v1407_v13 = vadd.f32 %v1401_v44, %v1319_v37  ;;  %v1551_v0 = vmul.f32 %v2823_v57, %v1515_v55  ;;  %v2833_v31 = vld [vmem:[%s3518_s2 + $0x4] ss:$0 sm:$0xff] }
 0x522   :  { %v1495_v39 = vrot.slane %v1489_v38, 7 }
 0x523   :  { %v1506_v40 = vadd.f32 %v1502_v35, %v1406_v36 }
 0x524   :  { %v1496_v45 = vsel %vm130_vm12, %v1494_v9, %v1495_v39  ;;  %v1499_v46 = vsel %vm130_vm12, %v1495_v39, %v1492_v6 }
 0x525   :  { %v1500_v47 = vmul.f32 %v2993_v11, %v1499_v46  ;;  %v1503_v48 = vmul.f32 %v3006_v28, %v1496_v45  ;;  %v1512_v14 = vadd.f32 %v2832_v34, %v1506_v40 }
 0x527   :  { %v1504_v49 = vadd.f32 %v1500_v47, %v1404_v43  ;;  %v1507_v50 = vadd.f32 %v1503_v48, %v1407_v13  ;;  %v1516_v56 = vmax.f32 %v1512_v14, 0.0 }
 0x529   :  { %v1510_v23 = vadd.f32 %v2832_v34, %v1504_v49  ;;  %v1513_v54 = vadd.f32 %v2832_v34, %v1507_v50  ;;  %v1552_v1 = vmul.f32 %v2827_v53, %v1516_v56 }
 0x52b   :  { %v1514_v61 = vmax.f32 %v1510_v23, 0.0  ;;  %v1517_v62 = vmax.f32 %v1513_v54, 0.0 }
 0x52d   :  { %v1550_v63 = vmul.f32 %v2822_v58, %v1514_v61  ;;  %v1553_v2 = vmul.f32 %v2828_v59, %v1517_v62 }
 0x52f   :  { %v1554_v51 = vpack.c.bf16 %v1551_v0, %v1550_v63  ;;  %v1555_v4 = vpack.c.bf16 %v1553_v2, %v1552_v1 }
 0x531   :  { %1629 = vmatmul.bf16.vlgmr.msra.gmra.mxu3 %v1554_v51  ;;  %1725 = vmatmul.bf16.vlgmr.msra.gmra.mxu0 %v1554_v51 }
 0x532   :  { %1730 = vmatmul.bf16.vlgmr.msra.gmra.mxu2 %v1555_v4  ;;  %1813 = vmatmul.bf16.vlgmr.msra.gmra.mxu1 %v1554_v51 }
 0x541   :  { %1634 = vmatmul.bf16.gmra.mxu3 %v1555_v4 }
 0x551   :  { %1818 = vmatmul.bf16.vlgmr.msrb.gmra.mxu3 %v1555_v4 }
 0x5ae   :  { %v1726_v8 = vpop.f32.mrf.mxu0 }
 0x5af   :  { %v1814_v6 = vpop.f32.mrf.mxu1 }
 0x5b0   :  { %v1824_v19 = vrot.slane %v1814_v6, 7 }
 0x5b4   :  { %v1630_v5 = vpop.f32.mrf.mxu3 }
 0x5b5   :  { %v1731_v38 = vpop.f32.mrf.mxu2  ;;  %v1640_v40 = vrot.slane %v1630_v5, 1 }
 0x5b6   :  { %v1728_v25 = vpop.f32.mrf.mxu0 }
 0x5b7   :  { %v1816_v9 = vpop.f32.mrf.mxu1 }
 0x5b8   :  { %v1825_v15 = vrot.slane %v1816_v9, 7 }
 0x5ba   :  { %v1830_v60 = vsel %vm130_vm12, %v1824_v19, %v1825_v15 }
 0x5bb   :  { %v1833_v26 = vmul.f32 %v2995_v16, %v1830_v60 }
 0x5bc   :  { %v1632_v7 = vpop.f32.mrf.mxu3 }
 0x5bd   :  { %v1641_v20 = vrot.slane %v1632_v7, 1  ;;  %v1733_v23 = vpop.f32.mrf.mxu2 }
 0x5bf   :  { %v1646_v46 = vsel %vm359_vm13, %v1640_v40, %v1641_v20 }
 0x5c0   :  { %v1648_v47 = vmul.f32 %v3010_v30, %v1646_v46 }
 0x5c2   :  { %v1736_v55 = vadd.f32 %v1726_v8, %v1648_v47 }
 0x5c4   :  { %v1635_v18 = vpop.f32.mrf.mxu3 }
 0x5c5   :  { %v1642_v21 = vrot.slane %v1635_v18, 1 }
 0x5c7   :  { %v1645_v22 = vsel %vm359_vm13, %v1641_v20, %v1642_v21 }
 0x5c8   :  { %v1649_v24 = vmul.f32 %v3008_v29, %v1645_v22 }
 0x5ca   :  { %v1737_v27 = vadd.f32 %v1728_v25, %v1649_v24 }
 0x5cc   :  { %v1837_v32 = vadd.f32 %v1833_v26, %v1737_v27  ;;  %v1637_v33 = vpop.f32.mrf.mxu3 }
 0x5cd   :  { %v1643_v34 = vrot.slane %v1637_v33, 1 }
 0x5ce   :  { %v1843_v35 = vadd.f32 %v2833_v31, %v1837_v32 }
 0x5cf   :  { %v1644_v37 = vsel %vm359_vm13, %v1642_v21, %v1643_v34  ;;  %v1647_v12 = vsel %vm359_vm13, %v1643_v34, %v1640_v40 }
 0x5d0   :  { %v1847_v36 = vmul.f32 %v2823_v57, %v1843_v35  ;;  %v1650_v29 = vmul.f32 %v3022_v42, %v1644_v37  ;;  %v1651_v42 = vmul.f32 %v3020_v41, %v1647_v12 }
 0x5d2   :  { %1851 = vst [vmem:[%s3520_s5 + $0x8] sm:$0xff] %v1847_v36  ;;  %v1738_v44 = vadd.f32 %v1731_v38, %v1650_v29  ;;  %v1739_v56 = vadd.f32 %v1733_v23, %v1651_v42 }
 0x5d4   :  { %v1819_v16 = vpop.f32.mrf.mxu3 }
 0x5d5   :  { %v1826_v39 = vrot.slane %v1819_v16, 7 }
 0x5d7   :  { %v1829_v43 = vsel %vm130_vm12, %v1825_v15, %v1826_v39 }
 0x5d8   :  { %v1834_v45 = vmul.f32 %v2991_v10, %v1829_v43 }
 0x5da   :  { %v1838_v13 = vadd.f32 %v1834_v45, %v1738_v44 }
 0x5dc   :  { %v1844_v48 = vadd.f32 %v2833_v31, %v1838_v13  ;;  %v1821_v14 = vpop.f32.mrf.mxu3 }
 0x5dd   :  { %v1827_v49 = vrot.slane %v1821_v14, 7 }
 0x5de   :  { %v1848_v50 = vmul.f32 %v2827_v53, %v1844_v48 }
 0x5df   :  { %v1828_v54 = vsel %vm130_vm12, %v1826_v39, %v1827_v49  ;;  %v1831_v10 = vsel %vm130_vm12, %v1827_v49, %v1824_v19 }
 0x5e0   :  { %1852 = vst [vmem:[%s3520_s5 + $0x10] sm:$0xff] %v1848_v50  ;;  %v1832_v30 = vmul.f32 %v2993_v11, %v1831_v10  ;;  %v1835_v41 = vmul.f32 %v3006_v28, %v1828_v54 }
 0x5e2   :  { %v1836_v57 = vadd.f32 %v1832_v30, %v1736_v55  ;;  %v1839_v61 = vadd.f32 %v1835_v41, %v1739_v56 }
 0x5e4   :  { %v1842_v53 = vadd.f32 %v2833_v31, %v1836_v57  ;;  %v1845_v62 = vadd.f32 %v2833_v31, %v1839_v61 }
 0x5e6   :  { %v1846_v63 = vmul.f32 %v2822_v58, %v1842_v53  ;;  %v1849_v3 = vmul.f32 %v2828_v59, %v1845_v62 }
 0x5e8   :  { %1850 = vst [vmem:[%s3520_s5] sm:$0xff] %v1846_v63 }
 0x5e9   :  { %1853 = vst [vmem:[%s3520_s5 + $0x18] sm:$0xff] %v1849_v3 }

</bundles_post_ra>
